<compile_context>
chip_gen: v5e
topology: v5e:2x2
jax: 0.10.0
libtpu: 0.0.40
codegen_flags: <defaults>
</compile_context>

<pallas_src>
import math
import functools
import numpy as np
import jax
import jax.numpy as jnp
from jax.experimental import pallas as pl
from jax.experimental.pallas import tpu as pltpu

PAD = 0
EPS = 1e-5          # PyTorch nn.LayerNorm default eps
NEG_BIG = -1e18     # masked_fill value (plain Python float)


def _layer_norm(x, g, b):
    mu = jnp.mean(x, axis=-1, keepdims=True)
    var = jnp.mean(jnp.square(x - mu), axis=-1, keepdims=True)
    return (x - mu) * jax.lax.rsqrt(var + EPS) * g + b


# ------------------------------------------------------------------ kernel

def fused_encoder_kernel(emb_ref, pos_ref, bias_ref,
                         ln1_g, ln1_b, wqkv, bqkv, wo, bo,
                         ln2_g, ln2_b, w1, b1, w2, b2,
                         fin_g, fin_b,
                         out_ref,
                         act_ref, yn_ref, acc_ref,
                         *, scale, n_head):
    """grid = (batch_block, layer, d_inner_chunk).

    The residual stream lives in act_ref across the layer axis; yn_ref/acc_ref
    carry the FFN input / accumulator across the d_inner-chunk axis."""
    l = pl.program_id(1)
    f = pl.program_id(2)
    n_l = pl.num_programs(1)
    n_f = pl.num_programs(2)

    Bblk, L, D = act_ref.shape
    dh = D // n_head

    # ---- layer-0 init: scaled token embeddings + sinusoidal positions ------
    @pl.when((l == 0) & (f == 0))
    def _init():
        act_ref[...] = emb_ref[...] * scale + pos_ref[...]

    # ---- multi-head self attention (pre-LN), once per (batch-block, layer) -
    @pl.when(f == 0)
    def _attention():
        x = act_ref[...]                                   # (Bblk, L, D) f32
        xn = _layer_norm(x, ln1_g[0], ln1_b[0]).astype(jnp.bfloat16)
        for b in range(Bblk):
            # fused QKV projection: one (L, D) @ (D, 3D) MXU matmul.
            qkv = jnp.dot(xn[b], wqkv[0],
                          preferred_element_type=jnp.float32) + bqkv[0]
            kb = bias_ref[b]                   # (1, L) additive PAD bias
            ctx_heads = []
            for h in range(n_head):
                c = h * dh
                q = qkv[:, c:c + dh].astype(jnp.bfloat16)
                k = qkv[:, D + c:D + c + dh].astype(jnp.bfloat16)
                v = qkv[:, 2 * D + c:2 * D + c + dh].astype(jnp.bfloat16)
                # 1/sqrt(dh) already folded into wq/bq at param-prep time.
                s = jnp.einsum('le,me->lm', q, k,
                               preferred_element_type=jnp.float32) + kb
                s = s - jnp.max(s, axis=-1, keepdims=True)
                p = jnp.exp(s)
                # deferred normalization: scale the (L, dh) context, not the
                # (L, L) probabilities; reciprocal runs on the EUP.
                inv = pl.reciprocal(jnp.sum(p, axis=-1, keepdims=True),
                                    approx=True)
                ctx_heads.append(
                    jnp.dot(p.astype(jnp.bfloat16), v,
                            preferred_element_type=jnp.float32) * inv)
            # lane-concat heads -> single (L, D) @ (D, D) output projection.
            ctx = jnp.concatenate(ctx_heads, axis=-1).astype(jnp.bfloat16)
            attn = jnp.dot(ctx, wo[0],
                           preferred_element_type=jnp.float32) + bo[0]
            act_ref[b] = attn + x[b]           # residual (dropout = identity)
        out1 = act_ref[...]
        yn_ref[...] = _layer_norm(out1, ln2_g[0], ln2_b[0]).astype(jnp.bfloat16)
        acc_ref[...] = jnp.zeros_like(acc_ref)

    # ---- position-wise FFN, chunk f of d_inner (w1/w2 streamed per chunk) --
    # TODO(synk): on v6e (128 MiB VMEM) the w1/w2 BlockSpecs could use a
    #             3-deep pipeline (pl.Buffered(3)) to hide the chunk DMA.
    for b in range(Bblk):
        h1 = jnp.maximum(
            jnp.dot(yn_ref[b], w1[0], preferred_element_type=jnp.float32)
            + b1[0], 0.0)
        acc_ref[b] = acc_ref[b] + jnp.dot(
            h1.astype(jnp.bfloat16), w2[0], preferred_element_type=jnp.float32)

    # ---- finalize layer at the last d_inner chunk ---------------------------
    @pl.when(f == n_f - 1)
    def _finish_layer():
        act_ref[...] = acc_ref[...] + b2[0] + act_ref[...]

    # ---- final LayerNorm, fused into the very last step ---------------------
    @pl.when((f == n_f - 1) & (l == n_l - 1))
    def _emit():
        out_ref[...] = _layer_norm(act_ref[...], fin_g[...],
                                   fin_b[...]).astype(out_ref.dtype)


# ------------------------------------------------------------------ wrapper

def prepare_kernel_params(layers, final, n_head, matmul_dtype=jnp.bfloat16):
    """Stack per-layer params, fuse Q/K/V weights into (D, 3D), fold the
    1/sqrt(dh) scale into the Q block, and cast matmul weights to bf16."""
    D = layers[0]["wq"].shape[0]
    dh = D // n_head
    inv = 1.0 / math.sqrt(dh)

    def qkv_w(p):   # (D, 3D); scale folded into Q columns
        return jnp.concatenate([p["wq"] * inv, p["wk"], p["wv"]], axis=1)

    def qkv_b(p):   # (1, 3D) lane-dense bias row
        return jnp.concatenate([p["bq"] * inv, p["bk"], p["bv"]], axis=1)

    stack = lambda fn, dt: jnp.stack([fn(p) for p in layers]).astype(dt)
    get = lambda name, dt: jnp.stack([p[name] for p in layers]).astype(dt)

    return dict(
        ln1_g=get("ln1_g", jnp.float32), ln1_b=get("ln1_b", jnp.float32),
        wqkv=stack(qkv_w, matmul_dtype), bqkv=stack(qkv_b, jnp.float32),
        wo=get("wo", matmul_dtype), bo=get("bo", jnp.float32),
        ln2_g=get("ffn_ln_g", jnp.float32), ln2_b=get("ffn_ln_b", jnp.float32),
        w1=get("w1", matmul_dtype), b1=get("b1", jnp.float32),
        w2=get("w2", matmul_dtype), b2=get("b2", jnp.float32),
        fin_g=final["ln_g"].astype(jnp.float32),
        fin_b=final["ln_b"].astype(jnp.float32),
    )


def _vmem_capacity_bytes():
    try:
        return int(pltpu.get_tpu_info().vmem_capacity_bytes)
    except Exception:
        return 64 * 1024 * 1024        # conservative (v7x per-TC VMEM)


def _pick_inner_tile(d_inner, max_tile=2048):
    if d_inner <= max_tile:
        return d_inner
    for t in range(max_tile, 127, -128):        # multiples of 128 that divide
        if d_inner % t == 0:
            return t
    return d_inner


def _pick_batch_block(B, L, D, budget_bytes=8 * 1024 * 1024):
    per_seq = max(L * D * 16, 1)    # rough residual/acc/yn + IO bytes per seq
    cap = max(1, budget_bytes // per_seq)
    blk = 1
    for cand in range(1, B + 1):
        if B % cand == 0 and cand <= cap:
            blk = cand
    return blk


def run_transformer(emb, pos, key_bias, kp, scale, n_head,
                    bblk=None, inner_tile=None, out_dtype=jnp.float32):
    B, L, D = emb.shape
    n_layers = kp["wqkv"].shape[0]
    d_inner = kp["w1"].shape[-1]

    if bblk is None:
        bblk = _pick_batch_block(B, L, D)
    assert B % bblk == 0
    if inner_tile is None:
        inner_tile = _pick_inner_tile(d_inner)
    assert d_inner % inner_tile == 0
    n_f = d_inner // inner_tile
    nb = B // bblk

    batch_blk = lambda b, l, f: (b, 0, 0)
    const2 = lambda b, l, f: (0, 0)
    layer3 = lambda b, l, f: (l, 0, 0)
    w1_map = lambda b, l, f: (l, 0, f)
    b1_map = lambda b, l, f: (l, 0, f)
    w2_map = lambda b, l, f: (l, f, 0)

    in_specs = [
        pl.BlockSpec((bblk, L, D), batch_blk),        # token embeddings
        pl.BlockSpec((L, D), const2),                 # positional signal
        pl.BlockSpec((bblk, 1, L), batch_blk),        # additive PAD key bias
        pl.BlockSpec((1, 1, D), layer3),              # ln1_g
        pl.BlockSpec((1, 1, D), layer3),              # ln1_b
        pl.BlockSpec((1, D, 3 * D), layer3),          # wqkv
        pl.BlockSpec((1, 1, 3 * D), layer3),          # bqkv
        pl.BlockSpec((1, D, D), layer3),              # wo
        pl.BlockSpec((1, 1, D), layer3),              # bo
        pl.BlockSpec((1, 1, D), layer3),              # ln2_g
        pl.BlockSpec((1, 1, D), layer3),              # ln2_b
        pl.BlockSpec((1, D, inner_tile), w1_map),     # w1 chunk
        pl.BlockSpec((1, 1, inner_tile), b1_map),     # b1 chunk
        pl.BlockSpec((1, inner_tile, D), w2_map),     # w2 chunk
        pl.BlockSpec((1, 1, D), layer3),              # b2
        pl.BlockSpec((1, D), const2),                 # final LN gamma
        pl.BlockSpec((1, D), const2),                 # final LN beta
    ]
    inputs = [emb, pos, key_bias,
              kp["ln1_g"], kp["ln1_b"], kp["wqkv"], kp["bqkv"],
              kp["wo"], kp["bo"], kp["ln2_g"], kp["ln2_b"],
              kp["w1"], kp["b1"], kp["w2"], kp["b2"],
              kp["fin_g"], kp["fin_b"]]

    out_specs = pl.BlockSpec((bblk, L, D), batch_blk)
    out_shape = jax.ShapeDtypeStruct((B, L, D), out_dtype)

    # ---- VMEM budget, clamped to this generation's physical capacity -------
    f32, bf16 = 4, 2
    act_scratch = bblk * L * D * (f32 + bf16 + f32)               # act, yn, acc
    io_blocks = 2 * bblk * L * (D * emb.dtype.itemsize
                                + D * jnp.dtype(out_dtype).itemsize + f32)
    attn_w = (3 * D * D + D * D) * bf16 + 9 * D * f32
    ffn_w = 2 * D * inner_tile * bf16 + (inner_tile + D) * f32
    weights = 2 * (attn_w + ffn_w)                                # dbl-buffered
    temps = (L * 3 * D * f32 + 4 * L * L * f32 + 2 * L * D * f32
             + L * inner_tile * f32 + bblk * L * D * f32)
    resident = (L * D + 2 * D) * f32
    need = act_scratch + io_blocks + weights + temps + resident
    cap = _vmem_capacity_bytes()
    vmem_limit = int(min(max(need * 1.25, 8 * 1024 * 1024), int(cap * 0.85)))

    return pl.pallas_call(
        functools.partial(fused_encoder_kernel, scale=scale, n_head=n_head),
        grid=(nb, n_layers, n_f),
        in_specs=in_specs,
        out_specs=out_specs,
        out_shape=out_shape,
        scratch_shapes=[pltpu.VMEM((bblk, L, D), jnp.float32),    # residual
                        pltpu.VMEM((bblk, L, D), jnp.bfloat16),   # LN'd FFN in
                        pltpu.VMEM((bblk, L, D), jnp.float32)],   # FFN accum
        compiler_params=pltpu.CompilerParams(
            dimension_semantics=("parallel", "arbitrary", "arbitrary"),
            vmem_limit_bytes=vmem_limit),
    )(*inputs)


# ------------------------------------------------------------------ params

def pos_signal(length, channels):
    """Sinusoidal position embedding, matching Embeddings._add_pos_embedding."""
    nt = channels // 2
    log_inc = math.log(10000.0 / 1.0) / (float(nt) - 1.0)
    position = jnp.arange(length, dtype=jnp.float32)
    inv_ts = jnp.exp(jnp.arange(nt, dtype=jnp.float32) * (-log_inc)) * 1.0
    scaled = position[:, None] * inv_ts[None, :]
    return jnp.concatenate([jnp.sin(scaled), jnp.cos(scaled)], axis=1)  # (L, C)


def init_params(key, vocab, d_model, d_inner, n_layers):
    scale = d_model ** 0.5
    keys = jax.random.split(key, 2 + n_layers)
    emb_w = jax.random.uniform(keys[0], (vocab, d_model), jnp.float32,
                               -1.0 / scale, 1.0 / scale)
    emb_w = emb_w.at[PAD].set(0.0)       # padding_idx row zeroed

    def lin(k, din, dout, std=0.08):
        return jax.random.normal(k, (din, dout), jnp.float32) * std

    def bias(k, d, std=0.02):
        return jax.random.normal(k, (1, d), jnp.float32) * std

    layers = []
    for li in range(n_layers):
        lk = jax.random.split(keys[1 + li], 12)
        layers.append(dict(
            ln1_g=jnp.ones((1, d_model), jnp.float32),
            ln1_b=jnp.zeros((1, d_model), jnp.float32),
            wq=lin(lk[0], d_model, d_model), bq=bias(lk[1], d_model),
            wk=lin(lk[2], d_model, d_model), bk=bias(lk[3], d_model),
            wv=lin(lk[4], d_model, d_model), bv=bias(lk[5], d_model),
            wo=lin(lk[6], d_model, d_model), bo=bias(lk[7], d_model),
            ffn_ln_g=jnp.ones((1, d_model), jnp.float32),
            ffn_ln_b=jnp.zeros((1, d_model), jnp.float32),
            w1=lin(lk[8], d_model, d_inner), b1=bias(lk[9], d_inner),
            w2=lin(lk[10], d_inner, d_model), b2=bias(lk[11], d_model),
        ))
    fk = jax.random.split(keys[-1], 2)
    final = dict(
        ln_g=jnp.ones((1, d_model), jnp.float32),
        ln_b=jnp.zeros((1, d_model), jnp.float32),
        pool_w=jax.random.normal(fk[0], (d_model, d_model), jnp.float32),
        pool_b=jnp.zeros((1, d_model), jnp.float32),
    )
    return emb_w, layers, final


# ------------------------------------------------------------------ forward

def transformer_encoder_forward(src_seq, emb_w, layers, final, n_head):
    B, L = src_seq.shape
    D = emb_w.shape[1]
    scale = float(D) ** 0.5
    # Embedding gather stays in plain JAX glue (table lookup, no Pallas win).
    emb = jnp.take(emb_w, src_seq, axis=0).astype(jnp.float32)        # (B,L,D)
    pos = pos_signal(L, D)                                            # (L,D)
    # Additive PAD bias (0 / -1e18), compact (B,1,L).
    key_bias = (src_seq == PAD).astype(jnp.float32)[:, None, :] * NEG_BIG
    kp = prepare_kernel_params(layers, final, n_head)
    out = run_transformer(emb, pos, key_bias, kp, scale, n_head)
    # Pooler in plain JAX: an M=1 matmul has no MXU win and keeping pool_w out
    # of the kernel frees it from being VMEM-resident for the whole grid.
    pooled = jnp.tanh(out[:, 0, :].astype(jnp.float32) @ final["pool_w"]
                      + final["pool_b"][0])
    return out, pooled


# pure-JAX f32 reference of the exact same math (eval mode), for verification
def ref_forward(src_seq, emb_w, layers, final, n_head):
    B, L = src_seq.shape
    D = emb_w.shape[1]
    dh = D // n_head
    out = jnp.take(emb_w, src_seq, axis=0) * (D ** 0.5) + pos_signal(L, D)
    mask = (src_seq == PAD)[:, None, None, :]        # (B,1,1,L) over keys
    for p in layers:
        xn = _layer_norm(out, p["ln1_g"][0], p["ln1_b"][0])
        q = xn @ p["wq"] + p["bq"][0]
        k = xn @ p["wk"] + p["bk"][0]
        v = xn @ p["wv"] + p["bv"][0]
        split = lambda t: t.reshape(B, L, n_head, dh).transpose(0, 2, 1, 3)
        qh, kh, vh = split(q) / math.sqrt(dh), split(k), split(v)
        s = jnp.einsum('bhqd,bhkd->bhqk', qh, kh)
        s = jnp.where(mask, NEG_BIG, s)
        s = s - jnp.max(s, axis=-1, keepdims=True)
        a = jnp.exp(s)
        a = a / jnp.sum(a, axis=-1, keepdims=True)
        ctx = jnp.einsum('bhqk,bhkd->bhqd', a, vh)
        ctx = ctx.transpose(0, 2, 1, 3).reshape(B, L, D)
        out1 = ctx @ p["wo"] + p["bo"][0] + out
        yn = _layer_norm(out1, p["ffn_ln_g"][0], p["ffn_ln_b"][0])
        h1 = jnp.maximum(yn @ p["w1"] + p["b1"][0], 0.0)
        out = h1 @ p["w2"] + p["b2"][0] + out1
    out_n = _layer_norm(out, final["ln_g"][0], final["ln_b"][0])
    pooled = jnp.tanh(out_n[:, 0] @ final["pool_w"] + final["pool_b"][0])
    return out_n, pooled


if __name__ == "__main__":
    key = jax.random.PRNGKey(0)
    vocab, n_layers, n_head = 50, 2, 4
    d_model, d_inner = 32, 64
    B, L = 2, 8

    pkey, skey = jax.random.split(key)
    emb_w, layers, final = init_params(pkey, vocab, d_model, d_inner, n_layers)
    src_seq = jax.random.randint(skey, (B, L), 1, vocab, dtype=jnp.int32)
    src_seq = src_seq.at[0, -2:].set(PAD)   # exercise the PAD attention mask

    out, pooled = transformer_encoder_forward(src_seq, emb_w, layers, final,
                                              n_head)
    out = jax.block_until_ready(out)
    pooled = jax.block_until_ready(pooled)

    ref_out, ref_pooled = ref_forward(src_seq, emb_w, layers, final, n_head)
    # Kernel uses bf16 matmul inputs with f32 accumulation; reference is pure
    # f32, so the tolerance is loosened accordingly.
    np.testing.assert_allclose(np.asarray(out), np.asarray(ref_out),
                               rtol=5e-2, atol=5e-2)
    np.testing.assert_allclose(np.asarray(pooled), np.asarray(ref_pooled),
                               rtol=5e-2, atol=5e-2)
    print("KERNEL_OK")
</pallas_src>

<mosaic_0001>
module attributes {stable_mosaic.version = 11 : i64} {
  func.func @fused_encoder_kernel(%arg0: i32, %arg1: i32, %arg2: i32, %arg3: memref<2x8x32xf32, #tpu.memory_space<vmem>>, %arg4: memref<8x32xf32, #tpu.memory_space<vmem>>, %arg5: memref<2x1x8xf32, #tpu.memory_space<vmem>>, %arg6: memref<1x1x32xf32, #tpu.memory_space<vmem>>, %arg7: memref<1x1x32xf32, #tpu.memory_space<vmem>>, %arg8: memref<1x32x96xbf16, #tpu.memory_space<vmem>>, %arg9: memref<1x1x96xf32, #tpu.memory_space<vmem>>, %arg10: memref<1x32x32xbf16, #tpu.memory_space<vmem>>, %arg11: memref<1x1x32xf32, #tpu.memory_space<vmem>>, %arg12: memref<1x1x32xf32, #tpu.memory_space<vmem>>, %arg13: memref<1x1x32xf32, #tpu.memory_space<vmem>>, %arg14: memref<1x32x64xbf16, #tpu.memory_space<vmem>>, %arg15: memref<1x1x64xf32, #tpu.memory_space<vmem>>, %arg16: memref<1x64x32xbf16, #tpu.memory_space<vmem>>, %arg17: memref<1x1x32xf32, #tpu.memory_space<vmem>>, %arg18: memref<1x32xf32, #tpu.memory_space<vmem>>, %arg19: memref<1x32xf32, #tpu.memory_space<vmem>>, %arg20: memref<2x8x32xf32, #tpu.memory_space<vmem>>, %arg21: memref<2x8x32xf32, #tpu.memory_space<vmem>>, %arg22: memref<2x8x32xbf16, #tpu.memory_space<vmem>>, %arg23: memref<2x8x32xf32, #tpu.memory_space<vmem>>) attributes {dimension_semantics = [#tpu.dimension_semantics<parallel>, #tpu.dimension_semantics<arbitrary>, #tpu.dimension_semantics<arbitrary>], iteration_bounds = array<i64: 1, 2, 1>, scalar_prefetch = 0 : i64, scratch_operands = 3 : i64, tpu.core_type = #tpu.core_type<tc>, window_params = [{transform_indices = @transform_0, window_bounds = array<i64: 2, 8, 32>}, {pipeline_mode = #tpu.pipeline_mode<synchronous>, transform_indices = @transform_1, window_bounds = array<i64: 8, 32>}, {transform_indices = @transform_2, window_bounds = array<i64: 2, 1, 8>}, {transform_indices = @transform_3, window_bounds = array<i64: 1, 1, 32>}, {transform_indices = @transform_4, window_bounds = array<i64: 1, 1, 32>}, {transform_indices = @transform_5, window_bounds = array<i64: 1, 32, 96>}, {transform_indices = @transform_6, window_bounds = array<i64: 1, 1, 96>}, {transform_indices = @transform_7, window_bounds = array<i64: 1, 32, 32>}, {transform_indices = @transform_8, window_bounds = array<i64: 1, 1, 32>}, {transform_indices = @transform_9, window_bounds = array<i64: 1, 1, 32>}, {transform_indices = @transform_10, window_bounds = array<i64: 1, 1, 32>}, {transform_indices = @transform_11, window_bounds = array<i64: 1, 32, 64>}, {transform_indices = @transform_12, window_bounds = array<i64: 1, 1, 64>}, {transform_indices = @transform_13, window_bounds = array<i64: 1, 64, 32>}, {transform_indices = @transform_14, window_bounds = array<i64: 1, 1, 32>}, {pipeline_mode = #tpu.pipeline_mode<synchronous>, transform_indices = @transform_15, window_bounds = array<i64: 1, 32>}, {pipeline_mode = #tpu.pipeline_mode<synchronous>, transform_indices = @transform_16, window_bounds = array<i64: 1, 32>}, {transform_indices = @transform_17, window_bounds = array<i64: 2, 8, 32>}]} {
    %c0_i32 = arith.constant 0 : i32
    %0 = arith.cmpi eq, %arg1, %c0_i32 : i32
    %c0_i32_0 = arith.constant 0 : i32
    %1 = arith.cmpi eq, %arg2, %c0_i32_0 : i32
    %2 = arith.andi %0, %1 : i1
    %3 = arith.extui %2 : i1 to i32
    %c0_i32_1 = arith.constant 0 : i32
    %4 = arith.cmpi ne, %3, %c0_i32_1 : i32
    scf.if %4 {
      %c0_47 = arith.constant 0 : index
      %c0_48 = arith.constant 0 : index
      %c0_49 = arith.constant 0 : index
      %58 = vector.load %arg3[%c0_47, %c0_48, %c0_49] : memref<2x8x32xf32, #tpu.memory_space<vmem>>, vector<2x8x32xf32>
      %cst_50 = arith.constant 5.65685415 : f32
      %59 = vector.broadcast %cst_50 : f32 to vector<2x8x32xf32>
      %60 = arith.mulf %58, %59 : vector<2x8x32xf32>
      %c0_51 = arith.constant 0 : index
      %c0_52 = arith.constant 0 : index
      %61 = vector.load %arg4[%c0_51, %c0_52] : memref<8x32xf32, #tpu.memory_space<vmem>>, vector<8x32xf32>
      %62 = vector.shape_cast %61 : vector<8x32xf32> to vector<1x8x32xf32>
      %63 = vector.broadcast %62 : vector<1x8x32xf32> to vector<2x8x32xf32>
      %64 = arith.addf %60, %63 : vector<2x8x32xf32>
      %c0_53 = arith.constant 0 : index
      %c0_54 = arith.constant 0 : index
      %c0_55 = arith.constant 0 : index
      %65 = vector.load %arg21[%c0_53, %c0_54, %c0_55] : memref<2x8x32xf32, #tpu.memory_space<vmem>>, vector<2x8x32xf32>
      tpu.vector_store %arg21[%c0_53, %c0_54, %c0_55], %64 {strides = array<i32>} : memref<2x8x32xf32, #tpu.memory_space<vmem>>, vector<2x8x32xf32>,
    } else {
    }
    %c0_i32_2 = arith.constant 0 : i32
    %5 = arith.cmpi eq, %arg2, %c0_i32_2 : i32
    %6 = arith.extui %5 : i1 to i32
    %c0_i32_3 = arith.constant 0 : i32
    %7 = arith.cmpi ne, %6, %c0_i32_3 : i32
    scf.if %7 {
      %c0_47 = arith.constant 0 : index
      %c0_48 = arith.constant 0 : index
      %c0_49 = arith.constant 0 : index
      %58 = vector.load %arg21[%c0_47, %c0_48, %c0_49] : memref<2x8x32xf32, #tpu.memory_space<vmem>>, vector<2x8x32xf32>
      %c0_50 = arith.constant 0 : index
      %c0_51 = arith.constant 0 : index
      %c0_52 = arith.constant 0 : index
      %59 = vector.load %arg6[%c0_50, %c0_51, %c0_52] : memref<1x1x32xf32, #tpu.memory_space<vmem>>, vector<1x1x32xf32>
      %60 = vector.shape_cast %59 : vector<1x1x32xf32> to vector<1x32xf32>
      %c0_53 = arith.constant 0 : index
      %c0_54 = arith.constant 0 : index
      %c0_55 = arith.constant 0 : index
      %61 = vector.load %arg7[%c0_53, %c0_54, %c0_55] : memref<1x1x32xf32, #tpu.memory_space<vmem>>, vector<1x1x32xf32>
      %62 = vector.shape_cast %61 : vector<1x1x32xf32> to vector<1x32xf32>
      %cst_56 = arith.constant dense<0.000000e+00> : vector<2x8xf32>
      %63 = vector.multi_reduction <add>, %58, %cst_56 [2] : vector<2x8x32xf32> to vector<2x8xf32>
      %64 = vector.shape_cast %63 : vector<2x8xf32> to vector<2x8x1xf32>
      %cst_57 = arith.constant 3.200000e+01 : f32
      %65 = vector.broadcast %cst_57 : f32 to vector<2x8x1xf32>
      %66 = arith.divf %64, %65 : vector<2x8x1xf32>
      %67 = vector.broadcast %66 : vector<2x8x1xf32> to vector<2x8x32xf32>
      %68 = arith.subf %58, %67 : vector<2x8x32xf32>
      %69 = arith.mulf %68, %68 : vector<2x8x32xf32>
      %cst_58 = arith.constant dense<0.000000e+00> : vector<2x8xf32>
      %70 = vector.multi_reduction <add>, %69, %cst_58 [2] : vector<2x8x32xf32> to vector<2x8xf32>
      %71 = vector.shape_cast %70 : vector<2x8xf32> to vector<2x8x1xf32>
      %cst_59 = arith.constant 3.200000e+01 : f32
      %72 = vector.broadcast %cst_59 : f32 to vector<2x8x1xf32>
      %73 = arith.divf %71, %72 : vector<2x8x1xf32>
      %74 = vector.broadcast %66 : vector<2x8x1xf32> to vector<2x8x32xf32>
      %75 = arith.subf %58, %74 : vector<2x8x32xf32>
      %cst_60 = arith.constant 9.99999974E-6 : f32
      %76 = vector.broadcast %cst_60 : f32 to vector<2x8x1xf32>
      %77 = arith.addf %73, %76 : vector<2x8x1xf32>
      %78 = math.rsqrt %77 : vector<2x8x1xf32>
      %79 = vector.broadcast %78 : vector<2x8x1xf32> to vector<2x8x32xf32>
      %80 = arith.mulf %75, %79 : vector<2x8x32xf32>
      %81 = vector.shape_cast %60 : vector<1x32xf32> to vector<1x1x32xf32>
      %82 = vector.broadcast %81 : vector<1x1x32xf32> to vector<2x8x32xf32>
      %83 = arith.mulf %80, %82 : vector<2x8x32xf32>
      %84 = vector.shape_cast %62 : vector<1x32xf32> to vector<1x1x32xf32>
      %85 = vector.broadcast %84 : vector<1x1x32xf32> to vector<2x8x32xf32>
      %86 = arith.addf %83, %85 : vector<2x8x32xf32>
      %87 = arith.truncf %86 : vector<2x8x32xf32> to vector<2x8x32xbf16>
      %88 = vector.extract_strided_slice %87 {offsets = [0, 0, 0], sizes = [1, 8, 32], strides = [1, 1, 1]} : vector<2x8x32xbf16> to vector<1x8x32xbf16>
      %89 = vector.shape_cast %88 : vector<1x8x32xbf16> to vector<8x32xbf16>
      %c0_61 = arith.constant 0 : index
      %c0_62 = arith.constant 0 : index
      %c0_63 = arith.constant 0 : index
      %90 = vector.load %arg8[%c0_61, %c0_62, %c0_63] : memref<1x32x96xbf16, #tpu.memory_space<vmem>>, vector<1x32x96xbf16>
      %91 = vector.shape_cast %90 : vector<1x32x96xbf16> to vector<32x96xbf16>
      %cst_64 = arith.constant dense<0.000000e+00> : vector<8x96xf32>
      %92 = tpu.matmul %89, %91, %cst_64 {dimension_numbers = #tpu.dot_dimension_numbers<[1], [0], [0], [1], [0, 0, 1, 1], [], []>} : vector<8x32xbf16>, vector<32x96xbf16>, vector<8x96xf32> -> vector<8x96xf32>
      %c0_65 = arith.constant 0 : index
      %c0_66 = arith.constant 0 : index
      %c0_67 = arith.constant 0 : index
      %93 = vector.load %arg9[%c0_65, %c0_66, %c0_67] : memref<1x1x96xf32, #tpu.memory_space<vmem>>, vector<1x1x96xf32>
      %94 = vector.shape_cast %93 : vector<1x1x96xf32> to vector<1x96xf32>
      %95 = vector.broadcast %94 : vector<1x96xf32> to vector<8x96xf32>
      %96 = arith.addf %92, %95 : vector<8x96xf32>
      %c0_68 = arith.constant 0 : index
      %c0_69 = arith.constant 0 : index
      %c0_70 = arith.constant 0 : index
      %97 = vector.load %arg5[%c0_68, %c0_69, %c0_70] : memref<2x1x8xf32, #tpu.memory_space<vmem>>, vector<1x1x8xf32>
      %98 = vector.shape_cast %97 : vector<1x1x8xf32> to vector<1x8xf32>
      %99 = vector.extract_strided_slice %96 {offsets = [0, 0], sizes = [8, 8], strides = [1, 1]} : vector<8x96xf32> to vector<8x8xf32>
      %100 = arith.truncf %99 : vector<8x8xf32> to vector<8x8xbf16>
      %101 = vector.extract_strided_slice %96 {offsets = [0, 32], sizes = [8, 8], strides = [1, 1]} : vector<8x96xf32> to vector<8x8xf32>
      %102 = arith.truncf %101 : vector<8x8xf32> to vector<8x8xbf16>
      %103 = vector.extract_strided_slice %96 {offsets = [0, 64], sizes = [8, 8], strides = [1, 1]} : vector<8x96xf32> to vector<8x8xf32>
      %104 = arith.truncf %103 : vector<8x8xf32> to vector<8x8xbf16>
      "tpu.trace_start"() <{level = 10 : i32, message = "le,me->lm"}> : () -> ()
      %cst_71 = arith.constant dense<0.000000e+00> : vector<8x8xf32>
      %105 = tpu.matmul %100, %102, %cst_71 {dimension_numbers = #tpu.dot_dimension_numbers<[1], [1], [0], [0], [0, 0, 1, 0], [], []>} : vector<8x8xbf16>, vector<8x8xbf16>, vector<8x8xf32> -> vector<8x8xf32>
      "tpu.trace_stop"() : () -> ()
      %106 = vector.broadcast %98 : vector<1x8xf32> to vector<8x8xf32>
      %107 = arith.addf %105, %106 : vector<8x8xf32>
      %cst_72 = arith.constant dense<0xFF800000> : vector<8xf32>
      %108 = vector.multi_reduction <maximumf>, %107, %cst_72 [1] : vector<8x8xf32> to vector<8xf32>
      %109 = vector.shape_cast %108 : vector<8xf32> to vector<8x1xf32>
      %110 = vector.broadcast %109 : vector<8x1xf32> to vector<8x8xf32>
      %111 = arith.subf %107, %110 : vector<8x8xf32>
      %112 = math.exp %111 : vector<8x8xf32>
      %cst_73 = arith.constant dense<0.000000e+00> : vector<8xf32>
      %113 = vector.multi_reduction <add>, %112, %cst_73 [1] : vector<8x8xf32> to vector<8xf32>
      %114 = vector.shape_cast %113 : vector<8xf32> to vector<8x1xf32>
      %115 = tpu.reciprocal %114 {approx = true} : vector<8x1xf32> -> vector<8x1xf32>
      %116 = arith.truncf %112 : vector<8x8xf32> to vector<8x8xbf16>
      %cst_74 = arith.constant dense<0.000000e+00> : vector<8x8xf32>
      %117 = tpu.matmul %116, %104, %cst_74 {dimension_numbers = #tpu.dot_dimension_numbers<[1], [0], [0], [1], [0, 0, 1, 1], [], []>} : vector<8x8xbf16>, vector<8x8xbf16>, vector<8x8xf32> -> vector<8x8xf32>
      %118 = vector.broadcast %115 : vector<8x1xf32> to vector<8x8xf32>
      %119 = arith.mulf %117, %118 : vector<8x8xf32>
      %120 = vector.extract_strided_slice %96 {offsets = [0, 8], sizes = [8, 8], strides = [1, 1]} : vector<8x96xf32> to vector<8x8xf32>
      %121 = arith.truncf %120 : vector<8x8xf32> to vector<8x8xbf16>
      %122 = vector.extract_strided_slice %96 {offsets = [0, 40], sizes = [8, 8], strides = [1, 1]} : vector<8x96xf32> to vector<8x8xf32>
      %123 = arith.truncf %122 : vector<8x8xf32> to vector<8x8xbf16>
      %124 = vector.extract_strided_slice %96 {offsets = [0, 72], sizes = [8, 8], strides = [1, 1]} : vector<8x96xf32> to vector<8x8xf32>
      %125 = arith.truncf %124 : vector<8x8xf32> to vector<8x8xbf16>
      "tpu.trace_start"() <{level = 10 : i32, message = "le,me->lm"}> : () -> ()
      %cst_75 = arith.constant dense<0.000000e+00> : vector<8x8xf32>
      %126 = tpu.matmul %121, %123, %cst_75 {dimension_numbers = #tpu.dot_dimension_numbers<[1], [1], [0], [0], [0, 0, 1, 0], [], []>} : vector<8x8xbf16>, vector<8x8xbf16>, vector<8x8xf32> -> vector<8x8xf32>
      "tpu.trace_stop"() : () -> ()
      %127 = vector.broadcast %98 : vector<1x8xf32> to vector<8x8xf32>
      %128 = arith.addf %126, %127 : vector<8x8xf32>
      %cst_76 = arith.constant dense<0xFF800000> : vector<8xf32>
      %129 = vector.multi_reduction <maximumf>, %128, %cst_76 [1] : vector<8x8xf32> to vector<8xf32>
      %130 = vector.shape_cast %129 : vector<8xf32> to vector<8x1xf32>
      %131 = vector.broadcast %130 : vector<8x1xf32> to vector<8x8xf32>
      %132 = arith.subf %128, %131 : vector<8x8xf32>
      %133 = math.exp %132 : vector<8x8xf32>
      %cst_77 = arith.constant dense<0.000000e+00> : vector<8xf32>
      %134 = vector.multi_reduction <add>, %133, %cst_77 [1] : vector<8x8xf32> to vector<8xf32>
      %135 = vector.shape_cast %134 : vector<8xf32> to vector<8x1xf32>
      %136 = tpu.reciprocal %135 {approx = true} : vector<8x1xf32> -> vector<8x1xf32>
      %137 = arith.truncf %133 : vector<8x8xf32> to vector<8x8xbf16>
      %cst_78 = arith.constant dense<0.000000e+00> : vector<8x8xf32>
      %138 = tpu.matmul %137, %125, %cst_78 {dimension_numbers = #tpu.dot_dimension_numbers<[1], [0], [0], [1], [0, 0, 1, 1], [], []>} : vector<8x8xbf16>, vector<8x8xbf16>, vector<8x8xf32> -> vector<8x8xf32>
      %139 = vector.broadcast %136 : vector<8x1xf32> to vector<8x8xf32>
      %140 = arith.mulf %138, %139 : vector<8x8xf32>
      %141 = vector.extract_strided_slice %96 {offsets = [0, 16], sizes = [8, 8], strides = [1, 1]} : vector<8x96xf32> to vector<8x8xf32>
      %142 = arith.truncf %141 : vector<8x8xf32> to vector<8x8xbf16>
      %143 = vector.extract_strided_slice %96 {offsets = [0, 48], sizes = [8, 8], strides = [1, 1]} : vector<8x96xf32> to vector<8x8xf32>
      %144 = arith.truncf %143 : vector<8x8xf32> to vector<8x8xbf16>
      %145 = vector.extract_strided_slice %96 {offsets = [0, 80], sizes = [8, 8], strides = [1, 1]} : vector<8x96xf32> to vector<8x8xf32>
      %146 = arith.truncf %145 : vector<8x8xf32> to vector<8x8xbf16>
      "tpu.trace_start"() <{level = 10 : i32, message = "le,me->lm"}> : () -> ()
      %cst_79 = arith.constant dense<0.000000e+00> : vector<8x8xf32>
      %147 = tpu.matmul %142, %144, %cst_79 {dimension_numbers = #tpu.dot_dimension_numbers<[1], [1], [0], [0], [0, 0, 1, 0], [], []>} : vector<8x8xbf16>, vector<8x8xbf16>, vector<8x8xf32> -> vector<8x8xf32>
      "tpu.trace_stop"() : () -> ()
      %148 = vector.broadcast %98 : vector<1x8xf32> to vector<8x8xf32>
      %149 = arith.addf %147, %148 : vector<8x8xf32>
      %cst_80 = arith.constant dense<0xFF800000> : vector<8xf32>
      %150 = vector.multi_reduction <maximumf>, %149, %cst_80 [1] : vector<8x8xf32> to vector<8xf32>
      %151 = vector.shape_cast %150 : vector<8xf32> to vector<8x1xf32>
      %152 = vector.broadcast %151 : vector<8x1xf32> to vector<8x8xf32>
      %153 = arith.subf %149, %152 : vector<8x8xf32>
      %154 = math.exp %153 : vector<8x8xf32>
      %cst_81 = arith.constant dense<0.000000e+00> : vector<8xf32>
      %155 = vector.multi_reduction <add>, %154, %cst_81 [1] : vector<8x8xf32> to vector<8xf32>
      %156 = vector.shape_cast %155 : vector<8xf32> to vector<8x1xf32>
      %157 = tpu.reciprocal %156 {approx = true} : vector<8x1xf32> -> vector<8x1xf32>
      %158 = arith.truncf %154 : vector<8x8xf32> to vector<8x8xbf16>
      %cst_82 = arith.constant dense<0.000000e+00> : vector<8x8xf32>
      %159 = tpu.matmul %158, %146, %cst_82 {dimension_numbers = #tpu.dot_dimension_numbers<[1], [0], [0], [1], [0, 0, 1, 1], [], []>} : vector<8x8xbf16>, vector<8x8xbf16>, vector<8x8xf32> -> vector<8x8xf32>
      %160 = vector.broadcast %157 : vector<8x1xf32> to vector<8x8xf32>
      %161 = arith.mulf %159, %160 : vector<8x8xf32>
      %162 = vector.extract_strided_slice %96 {offsets = [0, 24], sizes = [8, 8], strides = [1, 1]} : vector<8x96xf32> to vector<8x8xf32>
      %163 = arith.truncf %162 : vector<8x8xf32> to vector<8x8xbf16>
      %164 = vector.extract_strided_slice %96 {offsets = [0, 56], sizes = [8, 8], strides = [1, 1]} : vector<8x96xf32> to vector<8x8xf32>
      %165 = arith.truncf %164 : vector<8x8xf32> to vector<8x8xbf16>
      %166 = vector.extract_strided_slice %96 {offsets = [0, 88], sizes = [8, 8], strides = [1, 1]} : vector<8x96xf32> to vector<8x8xf32>
      %167 = arith.truncf %166 : vector<8x8xf32> to vector<8x8xbf16>
      "tpu.trace_start"() <{level = 10 : i32, message = "le,me->lm"}> : () -> ()
      %cst_83 = arith.constant dense<0.000000e+00> : vector<8x8xf32>
      %168 = tpu.matmul %163, %165, %cst_83 {dimension_numbers = #tpu.dot_dimension_numbers<[1], [1], [0], [0], [0, 0, 1, 0], [], []>} : vector<8x8xbf16>, vector<8x8xbf16>, vector<8x8xf32> -> vector<8x8xf32>
      "tpu.trace_stop"() : () -> ()
      %169 = vector.broadcast %98 : vector<1x8xf32> to vector<8x8xf32>
      %170 = arith.addf %168, %169 : vector<8x8xf32>
      %cst_84 = arith.constant dense<0xFF800000> : vector<8xf32>
      %171 = vector.multi_reduction <maximumf>, %170, %cst_84 [1] : vector<8x8xf32> to vector<8xf32>
      %172 = vector.shape_cast %171 : vector<8xf32> to vector<8x1xf32>
      %173 = vector.broadcast %172 : vector<8x1xf32> to vector<8x8xf32>
      %174 = arith.subf %170, %173 : vector<8x8xf32>
      %175 = math.exp %174 : vector<8x8xf32>
      %cst_85 = arith.constant dense<0.000000e+00> : vector<8xf32>
      %176 = vector.multi_reduction <add>, %175, %cst_85 [1] : vector<8x8xf32> to vector<8xf32>
      %177 = vector.shape_cast %176 : vector<8xf32> to vector<8x1xf32>
      %178 = tpu.reciprocal %177 {approx = true} : vector<8x1xf32> -> vector<8x1xf32>
      %179 = arith.truncf %175 : vector<8x8xf32> to vector<8x8xbf16>
      %cst_86 = arith.constant dense<0.000000e+00> : vector<8x8xf32>
      %180 = tpu.matmul %179, %167, %cst_86 {dimension_numbers = #tpu.dot_dimension_numbers<[1], [0], [0], [1], [0, 0, 1, 1], [], []>} : vector<8x8xbf16>, vector<8x8xbf16>, vector<8x8xf32> -> vector<8x8xf32>
      %181 = vector.broadcast %178 : vector<8x1xf32> to vector<8x8xf32>
      %182 = arith.mulf %180, %181 : vector<8x8xf32>
      %183 = tpu.concatenate %119, %140, %161, %182 in 1 : vector<8x8xf32>, vector<8x8xf32>, vector<8x8xf32>, vector<8x8xf32> -> vector<8x32xf32>
      %184 = arith.truncf %183 : vector<8x32xf32> to vector<8x32xbf16>
      %c0_87 = arith.constant 0 : index
      %c0_88 = arith.constant 0 : index
      %c0_89 = arith.constant 0 : index
      %185 = vector.load %arg10[%c0_87, %c0_88, %c0_89] : memref<1x32x32xbf16, #tpu.memory_space<vmem>>, vector<1x32x32xbf16>
      %186 = vector.shape_cast %185 : vector<1x32x32xbf16> to vector<32x32xbf16>
      %cst_90 = arith.constant dense<0.000000e+00> : vector<8x32xf32>
      %187 = tpu.matmul %184, %186, %cst_90 {dimension_numbers = #tpu.dot_dimension_numbers<[1], [0], [0], [1], [0, 0, 1, 1], [], []>} : vector<8x32xbf16>, vector<32x32xbf16>, vector<8x32xf32> -> vector<8x32xf32>
      %c0_91 = arith.constant 0 : index
      %c0_92 = arith.constant 0 : index
      %c0_93 = arith.constant 0 : index
      %188 = vector.load %arg11[%c0_91, %c0_92, %c0_93] : memref<1x1x32xf32, #tpu.memory_space<vmem>>, vector<1x1x32xf32>
      %189 = vector.shape_cast %188 : vector<1x1x32xf32> to vector<1x32xf32>
      %190 = vector.broadcast %189 : vector<1x32xf32> to vector<8x32xf32>
      %191 = arith.addf %187, %190 : vector<8x32xf32>
      %192 = vector.extract_strided_slice %58 {offsets = [0, 0, 0], sizes = [1, 8, 32], strides = [1, 1, 1]} : vector<2x8x32xf32> to vector<1x8x32xf32>
      %193 = vector.shape_cast %192 : vector<1x8x32xf32> to vector<8x32xf32>
      %194 = arith.addf %191, %193 : vector<8x32xf32>
      %c0_94 = arith.constant 0 : index
      %c0_95 = arith.constant 0 : index
      %c0_96 = arith.constant 0 : index
      %195 = vector.load %arg21[%c0_94, %c0_95, %c0_96] : memref<2x8x32xf32, #tpu.memory_space<vmem>>, vector<1x8x32xf32>
      %196 = vector.shape_cast %195 : vector<1x8x32xf32> to vector<8x32xf32>
      %197 = vector.shape_cast %194 : vector<8x32xf32> to vector<1x8x32xf32>
      tpu.vector_store %arg21[%c0_94, %c0_95, %c0_96], %197 {strides = array<i32>} : memref<2x8x32xf32, #tpu.memory_space<vmem>>, vector<1x8x32xf32>,
      %198 = vector.extract_strided_slice %87 {offsets = [1, 0, 0], sizes = [1, 8, 32], strides = [1, 1, 1]} : vector<2x8x32xbf16> to vector<1x8x32xbf16>
      %199 = vector.shape_cast %198 : vector<1x8x32xbf16> to vector<8x32xbf16>
      %c0_97 = arith.constant 0 : index
      %c0_98 = arith.constant 0 : index
      %c0_99 = arith.constant 0 : index
      %200 = vector.load %arg8[%c0_97, %c0_98, %c0_99] : memref<1x32x96xbf16, #tpu.memory_space<vmem>>, vector<1x32x96xbf16>
      %201 = vector.shape_cast %200 : vector<1x32x96xbf16> to vector<32x96xbf16>
      %cst_100 = arith.constant dense<0.000000e+00> : vector<8x96xf32>
      %202 = tpu.matmul %199, %201, %cst_100 {dimension_numbers = #tpu.dot_dimension_numbers<[1], [0], [0], [1], [0, 0, 1, 1], [], []>} : vector<8x32xbf16>, vector<32x96xbf16>, vector<8x96xf32> -> vector<8x96xf32>
      %c0_101 = arith.constant 0 : index
      %c0_102 = arith.constant 0 : index
      %c0_103 = arith.constant 0 : index
      %203 = vector.load %arg9[%c0_101, %c0_102, %c0_103] : memref<1x1x96xf32, #tpu.memory_space<vmem>>, vector<1x1x96xf32>
      %204 = vector.shape_cast %203 : vector<1x1x96xf32> to vector<1x96xf32>
      %205 = vector.broadcast %204 : vector<1x96xf32> to vector<8x96xf32>
      %206 = arith.addf %202, %205 : vector<8x96xf32>
      %c1_104 = arith.constant 1 : index
      %c0_105 = arith.constant 0 : index
      %c0_106 = arith.constant 0 : index
      %207 = vector.load %arg5[%c1_104, %c0_105, %c0_106] : memref<2x1x8xf32, #tpu.memory_space<vmem>>, vector<1x1x8xf32>
      %208 = vector.shape_cast %207 : vector<1x1x8xf32> to vector<1x8xf32>
      %209 = vector.extract_strided_slice %206 {offsets = [0, 0], sizes = [8, 8], strides = [1, 1]} : vector<8x96xf32> to vector<8x8xf32>
      %210 = arith.truncf %209 : vector<8x8xf32> to vector<8x8xbf16>
      %211 = vector.extract_strided_slice %206 {offsets = [0, 32], sizes = [8, 8], strides = [1, 1]} : vector<8x96xf32> to vector<8x8xf32>
      %212 = arith.truncf %211 : vector<8x8xf32> to vector<8x8xbf16>
      %213 = vector.extract_strided_slice %206 {offsets = [0, 64], sizes = [8, 8], strides = [1, 1]} : vector<8x96xf32> to vector<8x8xf32>
      %214 = arith.truncf %213 : vector<8x8xf32> to vector<8x8xbf16>
      "tpu.trace_start"() <{level = 10 : i32, message = "le,me->lm"}> : () -> ()
      %cst_107 = arith.constant dense<0.000000e+00> : vector<8x8xf32>
      %215 = tpu.matmul %210, %212, %cst_107 {dimension_numbers = #tpu.dot_dimension_numbers<[1], [1], [0], [0], [0, 0, 1, 0], [], []>} : vector<8x8xbf16>, vector<8x8xbf16>, vector<8x8xf32> -> vector<8x8xf32>
      "tpu.trace_stop"() : () -> ()
      %216 = vector.broadcast %208 : vector<1x8xf32> to vector<8x8xf32>
      %217 = arith.addf %215, %216 : vector<8x8xf32>
      %cst_108 = arith.constant dense<0xFF800000> : vector<8xf32>
      %218 = vector.multi_reduction <maximumf>, %217, %cst_108 [1] : vector<8x8xf32> to vector<8xf32>
      %219 = vector.shape_cast %218 : vector<8xf32> to vector<8x1xf32>
      %220 = vector.broadcast %219 : vector<8x1xf32> to vector<8x8xf32>
      %221 = arith.subf %217, %220 : vector<8x8xf32>
      %222 = math.exp %221 : vector<8x8xf32>
      %cst_109 = arith.constant dense<0.000000e+00> : vector<8xf32>
      %223 = vector.multi_reduction <add>, %222, %cst_109 [1] : vector<8x8xf32> to vector<8xf32>
      %224 = vector.shape_cast %223 : vector<8xf32> to vector<8x1xf32>
      %225 = tpu.reciprocal %224 {approx = true} : vector<8x1xf32> -> vector<8x1xf32>
      %226 = arith.truncf %222 : vector<8x8xf32> to vector<8x8xbf16>
      %cst_110 = arith.constant dense<0.000000e+00> : vector<8x8xf32>
      %227 = tpu.matmul %226, %214, %cst_110 {dimension_numbers = #tpu.dot_dimension_numbers<[1], [0], [0], [1], [0, 0, 1, 1], [], []>} : vector<8x8xbf16>, vector<8x8xbf16>, vector<8x8xf32> -> vector<8x8xf32>
      %228 = vector.broadcast %225 : vector<8x1xf32> to vector<8x8xf32>
      %229 = arith.mulf %227, %228 : vector<8x8xf32>
      %230 = vector.extract_strided_slice %206 {offsets = [0, 8], sizes = [8, 8], strides = [1, 1]} : vector<8x96xf32> to vector<8x8xf32>
      %231 = arith.truncf %230 : vector<8x8xf32> to vector<8x8xbf16>
      %232 = vector.extract_strided_slice %206 {offsets = [0, 40], sizes = [8, 8], strides = [1, 1]} : vector<8x96xf32> to vector<8x8xf32>
      %233 = arith.truncf %232 : vector<8x8xf32> to vector<8x8xbf16>
      %234 = vector.extract_strided_slice %206 {offsets = [0, 72], sizes = [8, 8], strides = [1, 1]} : vector<8x96xf32> to vector<8x8xf32>
      %235 = arith.truncf %234 : vector<8x8xf32> to vector<8x8xbf16>
      "tpu.trace_start"() <{level = 10 : i32, message = "le,me->lm"}> : () -> ()
      %cst_111 = arith.constant dense<0.000000e+00> : vector<8x8xf32>
      %236 = tpu.matmul %231, %233, %cst_111 {dimension_numbers = #tpu.dot_dimension_numbers<[1], [1], [0], [0], [0, 0, 1, 0], [], []>} : vector<8x8xbf16>, vector<8x8xbf16>, vector<8x8xf32> -> vector<8x8xf32>
      "tpu.trace_stop"() : () -> ()
      %237 = vector.broadcast %208 : vector<1x8xf32> to vector<8x8xf32>
      %238 = arith.addf %236, %237 : vector<8x8xf32>
      %cst_112 = arith.constant dense<0xFF800000> : vector<8xf32>
      %239 = vector.multi_reduction <maximumf>, %238, %cst_112 [1] : vector<8x8xf32> to vector<8xf32>
      %240 = vector.shape_cast %239 : vector<8xf32> to vector<8x1xf32>
      %241 = vector.broadcast %240 : vector<8x1xf32> to vector<8x8xf32>
      %242 = arith.subf %238, %241 : vector<8x8xf32>
      %243 = math.exp %242 : vector<8x8xf32>
      %cst_113 = arith.constant dense<0.000000e+00> : vector<8xf32>
      %244 = vector.multi_reduction <add>, %243, %cst_113 [1] : vector<8x8xf32> to vector<8xf32>
      %245 = vector.shape_cast %244 : vector<8xf32> to vector<8x1xf32>
      %246 = tpu.reciprocal %245 {approx = true} : vector<8x1xf32> -> vector<8x1xf32>
      %247 = arith.truncf %243 : vector<8x8xf32> to vector<8x8xbf16>
      %cst_114 = arith.constant dense<0.000000e+00> : vector<8x8xf32>
      %248 = tpu.matmul %247, %235, %cst_114 {dimension_numbers = #tpu.dot_dimension_numbers<[1], [0], [0], [1], [0, 0, 1, 1], [], []>} : vector<8x8xbf16>, vector<8x8xbf16>, vector<8x8xf32> -> vector<8x8xf32>
      %249 = vector.broadcast %246 : vector<8x1xf32> to vector<8x8xf32>
      %250 = arith.mulf %248, %249 : vector<8x8xf32>
      %251 = vector.extract_strided_slice %206 {offsets = [0, 16], sizes = [8, 8], strides = [1, 1]} : vector<8x96xf32> to vector<8x8xf32>
      %252 = arith.truncf %251 : vector<8x8xf32> to vector<8x8xbf16>
      %253 = vector.extract_strided_slice %206 {offsets = [0, 48], sizes = [8, 8], strides = [1, 1]} : vector<8x96xf32> to vector<8x8xf32>
      %254 = arith.truncf %253 : vector<8x8xf32> to vector<8x8xbf16>
      %255 = vector.extract_strided_slice %206 {offsets = [0, 80], sizes = [8, 8], strides = [1, 1]} : vector<8x96xf32> to vector<8x8xf32>
      %256 = arith.truncf %255 : vector<8x8xf32> to vector<8x8xbf16>
      "tpu.trace_start"() <{level = 10 : i32, message = "le,me->lm"}> : () -> ()
      %cst_115 = arith.constant dense<0.000000e+00> : vector<8x8xf32>
      %257 = tpu.matmul %252, %254, %cst_115 {dimension_numbers = #tpu.dot_dimension_numbers<[1], [1], [0], [0], [0, 0, 1, 0], [], []>} : vector<8x8xbf16>, vector<8x8xbf16>, vector<8x8xf32> -> vector<8x8xf32>
      "tpu.trace_stop"() : () -> ()
      %258 = vector.broadcast %208 : vector<1x8xf32> to vector<8x8xf32>
      %259 = arith.addf %257, %258 : vector<8x8xf32>
      %cst_116 = arith.constant dense<0xFF800000> : vector<8xf32>
      %260 = vector.multi_reduction <maximumf>, %259, %cst_116 [1] : vector<8x8xf32> to vector<8xf32>
      %261 = vector.shape_cast %260 : vector<8xf32> to vector<8x1xf32>
      %262 = vector.broadcast %261 : vector<8x1xf32> to vector<8x8xf32>
      %263 = arith.subf %259, %262 : vector<8x8xf32>
      %264 = math.exp %263 : vector<8x8xf32>
      %cst_117 = arith.constant dense<0.000000e+00> : vector<8xf32>
      %265 = vector.multi_reduction <add>, %264, %cst_117 [1] : vector<8x8xf32> to vector<8xf32>
      %266 = vector.shape_cast %265 : vector<8xf32> to vector<8x1xf32>
      %267 = tpu.reciprocal %266 {approx = true} : vector<8x1xf32> -> vector<8x1xf32>
      %268 = arith.truncf %264 : vector<8x8xf32> to vector<8x8xbf16>
      %cst_118 = arith.constant dense<0.000000e+00> : vector<8x8xf32>
      %269 = tpu.matmul %268, %256, %cst_118 {dimension_numbers = #tpu.dot_dimension_numbers<[1], [0], [0], [1], [0, 0, 1, 1], [], []>} : vector<8x8xbf16>, vector<8x8xbf16>, vector<8x8xf32> -> vector<8x8xf32>
      %270 = vector.broadcast %267 : vector<8x1xf32> to vector<8x8xf32>
      %271 = arith.mulf %269, %270 : vector<8x8xf32>
      %272 = vector.extract_strided_slice %206 {offsets = [0, 24], sizes = [8, 8], strides = [1, 1]} : vector<8x96xf32> to vector<8x8xf32>
      %273 = arith.truncf %272 : vector<8x8xf32> to vector<8x8xbf16>
      %274 = vector.extract_strided_slice %206 {offsets = [0, 56], sizes = [8, 8], strides = [1, 1]} : vector<8x96xf32> to vector<8x8xf32>
      %275 = arith.truncf %274 : vector<8x8xf32> to vector<8x8xbf16>
      %276 = vector.extract_strided_slice %206 {offsets = [0, 88], sizes = [8, 8], strides = [1, 1]} : vector<8x96xf32> to vector<8x8xf32>
      %277 = arith.truncf %276 : vector<8x8xf32> to vector<8x8xbf16>
      "tpu.trace_start"() <{level = 10 : i32, message = "le,me->lm"}> : () -> ()
      %cst_119 = arith.constant dense<0.000000e+00> : vector<8x8xf32>
      %278 = tpu.matmul %273, %275, %cst_119 {dimension_numbers = #tpu.dot_dimension_numbers<[1], [1], [0], [0], [0, 0, 1, 0], [], []>} : vector<8x8xbf16>, vector<8x8xbf16>, vector<8x8xf32> -> vector<8x8xf32>
      "tpu.trace_stop"() : () -> ()
      %279 = vector.broadcast %208 : vector<1x8xf32> to vector<8x8xf32>
      %280 = arith.addf %278, %279 : vector<8x8xf32>
      %cst_120 = arith.constant dense<0xFF800000> : vector<8xf32>
      %281 = vector.multi_reduction <maximumf>, %280, %cst_120 [1] : vector<8x8xf32> to vector<8xf32>
      %282 = vector.shape_cast %281 : vector<8xf32> to vector<8x1xf32>
      %283 = vector.broadcast %282 : vector<8x1xf32> to vector<8x8xf32>
      %284 = arith.subf %280, %283 : vector<8x8xf32>
      %285 = math.exp %284 : vector<8x8xf32>
      %cst_121 = arith.constant dense<0.000000e+00> : vector<8xf32>
      %286 = vector.multi_reduction <add>, %285, %cst_121 [1] : vector<8x8xf32> to vector<8xf32>
      %287 = vector.shape_cast %286 : vector<8xf32> to vector<8x1xf32>
      %288 = tpu.reciprocal %287 {approx = true} : vector<8x1xf32> -> vector<8x1xf32>
      %289 = arith.truncf %285 : vector<8x8xf32> to vector<8x8xbf16>
      %cst_122 = arith.constant dense<0.000000e+00> : vector<8x8xf32>
      %290 = tpu.matmul %289, %277, %cst_122 {dimension_numbers = #tpu.dot_dimension_numbers<[1], [0], [0], [1], [0, 0, 1, 1], [], []>} : vector<8x8xbf16>, vector<8x8xbf16>, vector<8x8xf32> -> vector<8x8xf32>
      %291 = vector.broadcast %288 : vector<8x1xf32> to vector<8x8xf32>
      %292 = arith.mulf %290, %291 : vector<8x8xf32>
      %293 = tpu.concatenate %229, %250, %271, %292 in 1 : vector<8x8xf32>, vector<8x8xf32>, vector<8x8xf32>, vector<8x8xf32> -> vector<8x32xf32>
      %294 = arith.truncf %293 : vector<8x32xf32> to vector<8x32xbf16>
      %c0_123 = arith.constant 0 : index
      %c0_124 = arith.constant 0 : index
      %c0_125 = arith.constant 0 : index
      %295 = vector.load %arg10[%c0_123, %c0_124, %c0_125] : memref<1x32x32xbf16, #tpu.memory_space<vmem>>, vector<1x32x32xbf16>
      %296 = vector.shape_cast %295 : vector<1x32x32xbf16> to vector<32x32xbf16>
      %cst_126 = arith.constant dense<0.000000e+00> : vector<8x32xf32>
      %297 = tpu.matmul %294, %296, %cst_126 {dimension_numbers = #tpu.dot_dimension_numbers<[1], [0], [0], [1], [0, 0, 1, 1], [], []>} : vector<8x32xbf16>, vector<32x32xbf16>, vector<8x32xf32> -> vector<8x32xf32>
      %c0_127 = arith.constant 0 : index
      %c0_128 = arith.constant 0 : index
      %c0_129 = arith.constant 0 : index
      %298 = vector.load %arg11[%c0_127, %c0_128, %c0_129] : memref<1x1x32xf32, #tpu.memory_space<vmem>>, vector<1x1x32xf32>
      %299 = vector.shape_cast %298 : vector<1x1x32xf32> to vector<1x32xf32>
      %300 = vector.broadcast %299 : vector<1x32xf32> to vector<8x32xf32>
      %301 = arith.addf %297, %300 : vector<8x32xf32>
      %302 = vector.extract_strided_slice %58 {offsets = [1, 0, 0], sizes = [1, 8, 32], strides = [1, 1, 1]} : vector<2x8x32xf32> to vector<1x8x32xf32>
      %303 = vector.shape_cast %302 : vector<1x8x32xf32> to vector<8x32xf32>
      %304 = arith.addf %301, %303 : vector<8x32xf32>
      %c1_130 = arith.constant 1 : index
      %c0_131 = arith.constant 0 : index
      %c0_132 = arith.constant 0 : index
      %305 = vector.load %arg21[%c1_130, %c0_131, %c0_132] : memref<2x8x32xf32, #tpu.memory_space<vmem>>, vector<1x8x32xf32>
      %306 = vector.shape_cast %305 : vector<1x8x32xf32> to vector<8x32xf32>
      %307 = vector.shape_cast %304 : vector<8x32xf32> to vector<1x8x32xf32>
      tpu.vector_store %arg21[%c1_130, %c0_131, %c0_132], %307 {strides = array<i32>} : memref<2x8x32xf32, #tpu.memory_space<vmem>>, vector<1x8x32xf32>,
      %c0_133 = arith.constant 0 : index
      %c0_134 = arith.constant 0 : index
      %c0_135 = arith.constant 0 : index
      %308 = vector.load %arg21[%c0_133, %c0_134, %c0_135] : memref<2x8x32xf32, #tpu.memory_space<vmem>>, vector<2x8x32xf32>
      %c0_136 = arith.constant 0 : index
      %c0_137 = arith.constant 0 : index
      %c0_138 = arith.constant 0 : index
      %309 = vector.load %arg12[%c0_136, %c0_137, %c0_138] : memref<1x1x32xf32, #tpu.memory_space<vmem>>, vector<1x1x32xf32>
      %310 = vector.shape_cast %309 : vector<1x1x32xf32> to vector<1x32xf32>
      %c0_139 = arith.constant 0 : index
      %c0_140 = arith.constant 0 : index
      %c0_141 = arith.constant 0 : index
      %311 = vector.load %arg13[%c0_139, %c0_140, %c0_141] : memref<1x1x32xf32, #tpu.memory_space<vmem>>, vector<1x1x32xf32>
      %312 = vector.shape_cast %311 : vector<1x1x32xf32> to vector<1x32xf32>
      %cst_142 = arith.constant dense<0.000000e+00> : vector<2x8xf32>
      %313 = vector.multi_reduction <add>, %308, %cst_142 [2] : vector<2x8x32xf32> to vector<2x8xf32>
      %314 = vector.shape_cast %313 : vector<2x8xf32> to vector<2x8x1xf32>
      %cst_143 = arith.constant 3.200000e+01 : f32
      %315 = vector.broadcast %cst_143 : f32 to vector<2x8x1xf32>
      %316 = arith.divf %314, %315 : vector<2x8x1xf32>
      %317 = vector.broadcast %316 : vector<2x8x1xf32> to vector<2x8x32xf32>
      %318 = arith.subf %308, %317 : vector<2x8x32xf32>
      %319 = arith.mulf %318, %318 : vector<2x8x32xf32>
      %cst_144 = arith.constant dense<0.000000e+00> : vector<2x8xf32>
      %320 = vector.multi_reduction <add>, %319, %cst_144 [2] : vector<2x8x32xf32> to vector<2x8xf32>
      %321 = vector.shape_cast %320 : vector<2x8xf32> to vector<2x8x1xf32>
      %cst_145 = arith.constant 3.200000e+01 : f32
      %322 = vector.broadcast %cst_145 : f32 to vector<2x8x1xf32>
      %323 = arith.divf %321, %322 : vector<2x8x1xf32>
      %324 = vector.broadcast %316 : vector<2x8x1xf32> to vector<2x8x32xf32>
      %325 = arith.subf %308, %324 : vector<2x8x32xf32>
      %cst_146 = arith.constant 9.99999974E-6 : f32
      %326 = vector.broadcast %cst_146 : f32 to vector<2x8x1xf32>
      %327 = arith.addf %323, %326 : vector<2x8x1xf32>
      %328 = math.rsqrt %327 : vector<2x8x1xf32>
      %329 = vector.broadcast %328 : vector<2x8x1xf32> to vector<2x8x32xf32>
      %330 = arith.mulf %325, %329 : vector<2x8x32xf32>
      %331 = vector.shape_cast %310 : vector<1x32xf32> to vector<1x1x32xf32>
      %332 = vector.broadcast %331 : vector<1x1x32xf32> to vector<2x8x32xf32>
      %333 = arith.mulf %330, %332 : vector<2x8x32xf32>
      %334 = vector.shape_cast %312 : vector<1x32xf32> to vector<1x1x32xf32>
      %335 = vector.broadcast %334 : vector<1x1x32xf32> to vector<2x8x32xf32>
      %336 = arith.addf %333, %335 : vector<2x8x32xf32>
      %337 = arith.truncf %336 : vector<2x8x32xf32> to vector<2x8x32xbf16>
      %c0_147 = arith.constant 0 : index
      %c0_148 = arith.constant 0 : index
      %c0_149 = arith.constant 0 : index
      %338 = vector.load %arg22[%c0_147, %c0_148, %c0_149] : memref<2x8x32xbf16, #tpu.memory_space<vmem>>, vector<2x8x32xbf16>
      tpu.vector_store %arg22[%c0_147, %c0_148, %c0_149], %337 {strides = array<i32>} : memref<2x8x32xbf16, #tpu.memory_space<vmem>>, vector<2x8x32xbf16>,
      %cst_150 = arith.constant 0.000000e+00 : f32
      %339 = vector.broadcast %cst_150 : f32 to vector<2x8x32xf32>
      %c0_151 = arith.constant 0 : index
      %c0_152 = arith.constant 0 : index
      %c0_153 = arith.constant 0 : index
      %340 = vector.load %arg23[%c0_151, %c0_152, %c0_153] : memref<2x8x32xf32, #tpu.memory_space<vmem>>, vector<2x8x32xf32>
      tpu.vector_store %arg23[%c0_151, %c0_152, %c0_153], %339 {strides = array<i32>} : memref<2x8x32xf32, #tpu.memory_space<vmem>>, vector<2x8x32xf32>,
    } else {
    }
    %c0 = arith.constant 0 : index
    %c0_4 = arith.constant 0 : index
    %c0_5 = arith.constant 0 : index
    %8 = vector.load %arg22[%c0, %c0_4, %c0_5] : memref<2x8x32xbf16, #tpu.memory_space<vmem>>, vector<1x8x32xbf16>
    %9 = vector.shape_cast %8 : vector<1x8x32xbf16> to vector<8x32xbf16>
    %c0_6 = arith.constant 0 : index
    %c0_7 = arith.constant 0 : index
    %c0_8 = arith.constant 0 : index
    %10 = vector.load %arg14[%c0_6, %c0_7, %c0_8] : memref<1x32x64xbf16, #tpu.memory_space<vmem>>, vector<1x32x64xbf16>
    %11 = vector.shape_cast %10 : vector<1x32x64xbf16> to vector<32x64xbf16>
    %cst = arith.constant dense<0.000000e+00> : vector<8x64xf32>
    %12 = tpu.matmul %9, %11, %cst {dimension_numbers = #tpu.dot_dimension_numbers<[1], [0], [0], [1], [0, 0, 1, 1], [], []>} : vector<8x32xbf16>, vector<32x64xbf16>, vector<8x64xf32> -> vector<8x64xf32>
    %c0_9 = arith.constant 0 : index
    %c0_10 = arith.constant 0 : index
    %c0_11 = arith.constant 0 : index
    %13 = vector.load %arg15[%c0_9, %c0_10, %c0_11] : memref<1x1x64xf32, #tpu.memory_space<vmem>>, vector<1x1x64xf32>
    %14 = vector.shape_cast %13 : vector<1x1x64xf32> to vector<1x64xf32>
    %15 = vector.broadcast %14 : vector<1x64xf32> to vector<8x64xf32>
    %16 = arith.addf %12, %15 : vector<8x64xf32>
    %cst_12 = arith.constant 0.000000e+00 : f32
    %17 = vector.broadcast %cst_12 : f32 to vector<8x64xf32>
    %18 = arith.maximumf %16, %17 : vector<8x64xf32>
    %c0_13 = arith.constant 0 : index
    %c0_14 = arith.constant 0 : index
    %c0_15 = arith.constant 0 : index
    %19 = vector.load %arg23[%c0_13, %c0_14, %c0_15] : memref<2x8x32xf32, #tpu.memory_space<vmem>>, vector<1x8x32xf32>
    %20 = vector.shape_cast %19 : vector<1x8x32xf32> to vector<8x32xf32>
    %21 = arith.truncf %18 : vector<8x64xf32> to vector<8x64xbf16>
    %c0_16 = arith.constant 0 : index
    %c0_17 = arith.constant 0 : index
    %c0_18 = arith.constant 0 : index
    %22 = vector.load %arg16[%c0_16, %c0_17, %c0_18] : memref<1x64x32xbf16, #tpu.memory_space<vmem>>, vector<1x64x32xbf16>
    %23 = vector.shape_cast %22 : vector<1x64x32xbf16> to vector<64x32xbf16>
    %cst_19 = arith.constant dense<0.000000e+00> : vector<8x32xf32>
    %24 = tpu.matmul %21, %23, %cst_19 {dimension_numbers = #tpu.dot_dimension_numbers<[1], [0], [0], [1], [0, 0, 1, 1], [], []>} : vector<8x64xbf16>, vector<64x32xbf16>, vector<8x32xf32> -> vector<8x32xf32>
    %25 = arith.addf %20, %24 : vector<8x32xf32>
    %c0_20 = arith.constant 0 : index
    %c0_21 = arith.constant 0 : index
    %c0_22 = arith.constant 0 : index
    %26 = vector.load %arg23[%c0_20, %c0_21, %c0_22] : memref<2x8x32xf32, #tpu.memory_space<vmem>>, vector<1x8x32xf32>
    %27 = vector.shape_cast %26 : vector<1x8x32xf32> to vector<8x32xf32>
    %28 = vector.shape_cast %25 : vector<8x32xf32> to vector<1x8x32xf32>
    tpu.vector_store %arg23[%c0_20, %c0_21, %c0_22], %28 {strides = array<i32>} : memref<2x8x32xf32, #tpu.memory_space<vmem>>, vector<1x8x32xf32>,
    %c1 = arith.constant 1 : index
    %c0_23 = arith.constant 0 : index
    %c0_24 = arith.constant 0 : index
    %29 = vector.load %arg22[%c1, %c0_23, %c0_24] : memref<2x8x32xbf16, #tpu.memory_space<vmem>>, vector<1x8x32xbf16>
    %30 = vector.shape_cast %29 : vector<1x8x32xbf16> to vector<8x32xbf16>
    %c0_25 = arith.constant 0 : index
    %c0_26 = arith.constant 0 : index
    %c0_27 = arith.constant 0 : index
    %31 = vector.load %arg14[%c0_25, %c0_26, %c0_27] : memref<1x32x64xbf16, #tpu.memory_space<vmem>>, vector<1x32x64xbf16>
    %32 = vector.shape_cast %31 : vector<1x32x64xbf16> to vector<32x64xbf16>
    %cst_28 = arith.constant dense<0.000000e+00> : vector<8x64xf32>
    %33 = tpu.matmul %30, %32, %cst_28 {dimension_numbers = #tpu.dot_dimension_numbers<[1], [0], [0], [1], [0, 0, 1, 1], [], []>} : vector<8x32xbf16>, vector<32x64xbf16>, vector<8x64xf32> -> vector<8x64xf32>
    %c0_29 = arith.constant 0 : index
    %c0_30 = arith.constant 0 : index
    %c0_31 = arith.constant 0 : index
    %34 = vector.load %arg15[%c0_29, %c0_30, %c0_31] : memref<1x1x64xf32, #tpu.memory_space<vmem>>, vector<1x1x64xf32>
    %35 = vector.shape_cast %34 : vector<1x1x64xf32> to vector<1x64xf32>
    %36 = vector.broadcast %35 : vector<1x64xf32> to vector<8x64xf32>
    %37 = arith.addf %33, %36 : vector<8x64xf32>
    %cst_32 = arith.constant 0.000000e+00 : f32
    %38 = vector.broadcast %cst_32 : f32 to vector<8x64xf32>
    %39 = arith.maximumf %37, %38 : vector<8x64xf32>
    %c1_33 = arith.constant 1 : index
    %c0_34 = arith.constant 0 : index
    %c0_35 = arith.constant 0 : index
    %40 = vector.load %arg23[%c1_33, %c0_34, %c0_35] : memref<2x8x32xf32, #tpu.memory_space<vmem>>, vector<1x8x32xf32>
    %41 = vector.shape_cast %40 : vector<1x8x32xf32> to vector<8x32xf32>
    %42 = arith.truncf %39 : vector<8x64xf32> to vector<8x64xbf16>
    %c0_36 = arith.constant 0 : index
    %c0_37 = arith.constant 0 : index
    %c0_38 = arith.constant 0 : index
    %43 = vector.load %arg16[%c0_36, %c0_37, %c0_38] : memref<1x64x32xbf16, #tpu.memory_space<vmem>>, vector<1x64x32xbf16>
    %44 = vector.shape_cast %43 : vector<1x64x32xbf16> to vector<64x32xbf16>
    %cst_39 = arith.constant dense<0.000000e+00> : vector<8x32xf32>
    %45 = tpu.matmul %42, %44, %cst_39 {dimension_numbers = #tpu.dot_dimension_numbers<[1], [0], [0], [1], [0, 0, 1, 1], [], []>} : vector<8x64xbf16>, vector<64x32xbf16>, vector<8x32xf32> -> vector<8x32xf32>
    %46 = arith.addf %41, %45 : vector<8x32xf32>
    %c1_40 = arith.constant 1 : index
    %c0_41 = arith.constant 0 : index
    %c0_42 = arith.constant 0 : index
    %47 = vector.load %arg23[%c1_40, %c0_41, %c0_42] : memref<2x8x32xf32, #tpu.memory_space<vmem>>, vector<1x8x32xf32>
    %48 = vector.shape_cast %47 : vector<1x8x32xf32> to vector<8x32xf32>
    %49 = vector.shape_cast %46 : vector<8x32xf32> to vector<1x8x32xf32>
    tpu.vector_store %arg23[%c1_40, %c0_41, %c0_42], %49 {strides = array<i32>} : memref<2x8x32xf32, #tpu.memory_space<vmem>>, vector<1x8x32xf32>,
    %c0_i32_43 = arith.constant 0 : i32
    %50 = arith.cmpi eq, %arg2, %c0_i32_43 : i32
    %51 = arith.extui %50 : i1 to i32
    %c0_i32_44 = arith.constant 0 : i32
    %52 = arith.cmpi ne, %51, %c0_i32_44 : i32
    scf.if %52 {
      %c0_47 = arith.constant 0 : index
      %c0_48 = arith.constant 0 : index
      %c0_49 = arith.constant 0 : index
      %58 = vector.load %arg23[%c0_47, %c0_48, %c0_49] : memref<2x8x32xf32, #tpu.memory_space<vmem>>, vector<2x8x32xf32>
      %c0_50 = arith.constant 0 : index
      %c0_51 = arith.constant 0 : index
      %c0_52 = arith.constant 0 : index
      %59 = vector.load %arg17[%c0_50, %c0_51, %c0_52] : memref<1x1x32xf32, #tpu.memory_space<vmem>>, vector<1x1x32xf32>
      %60 = vector.shape_cast %59 : vector<1x1x32xf32> to vector<1x32xf32>
      %61 = vector.shape_cast %60 : vector<1x32xf32> to vector<1x1x32xf32>
      %62 = vector.broadcast %61 : vector<1x1x32xf32> to vector<2x8x32xf32>
      %63 = arith.addf %58, %62 : vector<2x8x32xf32>
      %c0_53 = arith.constant 0 : index
      %c0_54 = arith.constant 0 : index
      %c0_55 = arith.constant 0 : index
      %64 = vector.load %arg21[%c0_53, %c0_54, %c0_55] : memref<2x8x32xf32, #tpu.memory_space<vmem>>, vector<2x8x32xf32>
      %65 = arith.addf %63, %64 : vector<2x8x32xf32>
      %c0_56 = arith.constant 0 : index
      %c0_57 = arith.constant 0 : index
      %c0_58 = arith.constant 0 : index
      %66 = vector.load %arg21[%c0_56, %c0_57, %c0_58] : memref<2x8x32xf32, #tpu.memory_space<vmem>>, vector<2x8x32xf32>
      tpu.vector_store %arg21[%c0_56, %c0_57, %c0_58], %65 {strides = array<i32>} : memref<2x8x32xf32, #tpu.memory_space<vmem>>, vector<2x8x32xf32>,
    } else {
    }
    %c0_i32_45 = arith.constant 0 : i32
    %53 = arith.cmpi eq, %arg2, %c0_i32_45 : i32
    %c1_i32 = arith.constant 1 : i32
    %54 = arith.cmpi eq, %arg1, %c1_i32 : i32
    %55 = arith.andi %53, %54 : i1
    %56 = arith.extui %55 : i1 to i32
    %c0_i32_46 = arith.constant 0 : i32
    %57 = arith.cmpi ne, %56, %c0_i32_46 : i32
    scf.if %57 {
      %c0_47 = arith.constant 0 : index
      %c0_48 = arith.constant 0 : index
      %c0_49 = arith.constant 0 : index
      %58 = vector.load %arg21[%c0_47, %c0_48, %c0_49] : memref<2x8x32xf32, #tpu.memory_space<vmem>>, vector<2x8x32xf32>
      %c0_50 = arith.constant 0 : index
      %c0_51 = arith.constant 0 : index
      %59 = vector.load %arg18[%c0_50, %c0_51] : memref<1x32xf32, #tpu.memory_space<vmem>>, vector<1x32xf32>
      %c0_52 = arith.constant 0 : index
      %c0_53 = arith.constant 0 : index
      %60 = vector.load %arg19[%c0_52, %c0_53] : memref<1x32xf32, #tpu.memory_space<vmem>>, vector<1x32xf32>
      %cst_54 = arith.constant dense<0.000000e+00> : vector<2x8xf32>
      %61 = vector.multi_reduction <add>, %58, %cst_54 [2] : vector<2x8x32xf32> to vector<2x8xf32>
      %62 = vector.shape_cast %61 : vector<2x8xf32> to vector<2x8x1xf32>
      %cst_55 = arith.constant 3.200000e+01 : f32
      %63 = vector.broadcast %cst_55 : f32 to vector<2x8x1xf32>
      %64 = arith.divf %62, %63 : vector<2x8x1xf32>
      %65 = vector.broadcast %64 : vector<2x8x1xf32> to vector<2x8x32xf32>
      %66 = arith.subf %58, %65 : vector<2x8x32xf32>
      %67 = arith.mulf %66, %66 : vector<2x8x32xf32>
      %cst_56 = arith.constant dense<0.000000e+00> : vector<2x8xf32>
      %68 = vector.multi_reduction <add>, %67, %cst_56 [2] : vector<2x8x32xf32> to vector<2x8xf32>
      %69 = vector.shape_cast %68 : vector<2x8xf32> to vector<2x8x1xf32>
      %cst_57 = arith.constant 3.200000e+01 : f32
      %70 = vector.broadcast %cst_57 : f32 to vector<2x8x1xf32>
      %71 = arith.divf %69, %70 : vector<2x8x1xf32>
      %72 = vector.broadcast %64 : vector<2x8x1xf32> to vector<2x8x32xf32>
      %73 = arith.subf %58, %72 : vector<2x8x32xf32>
      %cst_58 = arith.constant 9.99999974E-6 : f32
      %74 = vector.broadcast %cst_58 : f32 to vector<2x8x1xf32>
      %75 = arith.addf %71, %74 : vector<2x8x1xf32>
      %76 = math.rsqrt %75 : vector<2x8x1xf32>
      %77 = vector.broadcast %76 : vector<2x8x1xf32> to vector<2x8x32xf32>
      %78 = arith.mulf %73, %77 : vector<2x8x32xf32>
      %79 = vector.shape_cast %59 : vector<1x32xf32> to vector<1x1x32xf32>
      %80 = vector.broadcast %79 : vector<1x1x32xf32> to vector<2x8x32xf32>
      %81 = arith.mulf %78, %80 : vector<2x8x32xf32>
      %82 = vector.shape_cast %60 : vector<1x32xf32> to vector<1x1x32xf32>
      %83 = vector.broadcast %82 : vector<1x1x32xf32> to vector<2x8x32xf32>
      %84 = arith.addf %81, %83 : vector<2x8x32xf32>
      %c0_59 = arith.constant 0 : index
      %c0_60 = arith.constant 0 : index
      %c0_61 = arith.constant 0 : index
      %85 = vector.load %arg20[%c0_59, %c0_60, %c0_61] : memref<2x8x32xf32, #tpu.memory_space<vmem>>, vector<2x8x32xf32>
      tpu.vector_store %arg20[%c0_59, %c0_60, %c0_61], %84 {strides = array<i32>} : memref<2x8x32xf32, #tpu.memory_space<vmem>>, vector<2x8x32xf32>,
    } else {
    }
    return
  }
  func.func @transform_0(%arg0: i32, %arg1: i32, %arg2: i32) -> (i32, i32, i32) {
    %c0_i32 = arith.constant 0 : i32
    %c0_i32_0 = arith.constant 0 : i32
    %c0_i32_1 = arith.constant 0 : i32
    return %arg0, %c0_i32, %c0_i32_0 : i32, i32, i32
  }
  func.func @transform_1(%arg0: i32, %arg1: i32, %arg2: i32) -> (i32, i32) {
    %c0_i32 = arith.constant 0 : i32
    %c0_i32_0 = arith.constant 0 : i32
    %c0_i32_1 = arith.constant 0 : i32
    return %c0_i32, %c0_i32_0 : i32, i32
  }
  func.func @transform_2(%arg0: i32, %arg1: i32, %arg2: i32) -> (i32, i32, i32) {
    %c0_i32 = arith.constant 0 : i32
    %c0_i32_0 = arith.constant 0 : i32
    %c0_i32_1 = arith.constant 0 : i32
    return %arg0, %c0_i32, %c0_i32_0 : i32, i32, i32
  }
  func.func @transform_3(%arg0: i32, %arg1: i32, %arg2: i32) -> (i32, i32, i32) {
    %c0_i32 = arith.constant 0 : i32
    %c0_i32_0 = arith.constant 0 : i32
    %c0_i32_1 = arith.constant 0 : i32
    return %arg1, %c0_i32, %c0_i32_0 : i32, i32, i32
  }
  func.func @transform_4(%arg0: i32, %arg1: i32, %arg2: i32) -> (i32, i32, i32) {
    %c0_i32 = arith.constant 0 : i32
    %c0_i32_0 = arith.constant 0 : i32
    %c0_i32_1 = arith.constant 0 : i32
    return %arg1, %c0_i32, %c0_i32_0 : i32, i32, i32
  }
  func.func @transform_5(%arg0: i32, %arg1: i32, %arg2: i32) -> (i32, i32, i32) {
    %c0_i32 = arith.constant 0 : i32
    %c0_i32_0 = arith.constant 0 : i32
    %c0_i32_1 = arith.constant 0 : i32
    return %arg1, %c0_i32, %c0_i32_0 : i32, i32, i32
  }
  func.func @transform_6(%arg0: i32, %arg1: i32, %arg2: i32) -> (i32, i32, i32) {
    %c0_i32 = arith.constant 0 : i32
    %c0_i32_0 = arith.constant 0 : i32
    %c0_i32_1 = arith.constant 0 : i32
    return %arg1, %c0_i32, %c0_i32_0 : i32, i32, i32
  }
  func.func @transform_7(%arg0: i32, %arg1: i32, %arg2: i32) -> (i32, i32, i32) {
    %c0_i32 = arith.constant 0 : i32
    %c0_i32_0 = arith.constant 0 : i32
    %c0_i32_1 = arith.constant 0 : i32
    return %arg1, %c0_i32, %c0_i32_0 : i32, i32, i32
  }
  func.func @transform_8(%arg0: i32, %arg1: i32, %arg2: i32) -> (i32, i32, i32) {
    %c0_i32 = arith.constant 0 : i32
    %c0_i32_0 = arith.constant 0 : i32
    %c0_i32_1 = arith.constant 0 : i32
    return %arg1, %c0_i32, %c0_i32_0 : i32, i32, i32
  }
  func.func @transform_9(%arg0: i32, %arg1: i32, %arg2: i32) -> (i32, i32, i32) {
    %c0_i32 = arith.constant 0 : i32
    %c0_i32_0 = arith.constant 0 : i32
    %c0_i32_1 = arith.constant 0 : i32
    return %arg1, %c0_i32, %c0_i32_0 : i32, i32, i32
  }
  func.func @transform_10(%arg0: i32, %arg1: i32, %arg2: i32) -> (i32, i32, i32) {
    %c0_i32 = arith.constant 0 : i32
    %c0_i32_0 = arith.constant 0 : i32
    %c0_i32_1 = arith.constant 0 : i32
    return %arg1, %c0_i32, %c0_i32_0 : i32, i32, i32
  }
  func.func @transform_11(%arg0: i32, %arg1: i32, %arg2: i32) -> (i32, i32, i32) {
    %c0_i32 = arith.constant 0 : i32
    %c0_i32_0 = arith.constant 0 : i32
    return %arg1, %c0_i32, %arg2 : i32, i32, i32
  }
  func.func @transform_12(%arg0: i32, %arg1: i32, %arg2: i32) -> (i32, i32, i32) {
    %c0_i32 = arith.constant 0 : i32
    %c0_i32_0 = arith.constant 0 : i32
    return %arg1, %c0_i32, %arg2 : i32, i32, i32
  }
  func.func @transform_13(%arg0: i32, %arg1: i32, %arg2: i32) -> (i32, i32, i32) {
    %c0_i32 = arith.constant 0 : i32
    %c0_i32_0 = arith.constant 0 : i32
    return %arg1, %arg2, %c0_i32 : i32, i32, i32
  }
  func.func @transform_14(%arg0: i32, %arg1: i32, %arg2: i32) -> (i32, i32, i32) {
    %c0_i32 = arith.constant 0 : i32
    %c0_i32_0 = arith.constant 0 : i32
    %c0_i32_1 = arith.constant 0 : i32
    return %arg1, %c0_i32, %c0_i32_0 : i32, i32, i32
  }
  func.func @transform_15(%arg0: i32, %arg1: i32, %arg2: i32) -> (i32, i32) {
    %c0_i32 = arith.constant 0 : i32
    %c0_i32_0 = arith.constant 0 : i32
    %c0_i32_1 = arith.constant 0 : i32
    return %c0_i32, %c0_i32_0 : i32, i32
  }
  func.func @transform_16(%arg0: i32, %arg1: i32, %arg2: i32) -> (i32, i32) {
    %c0_i32 = arith.constant 0 : i32
    %c0_i32_0 = arith.constant 0 : i32
    %c0_i32_1 = arith.constant 0 : i32
    return %c0_i32, %c0_i32_0 : i32, i32
  }
  func.func @transform_17(%arg0: i32, %arg1: i32, %arg2: i32) -> (i32, i32, i32) {
    %c0_i32 = arith.constant 0 : i32
    %c0_i32_0 = arith.constant 0 : i32
    %c0_i32_1 = arith.constant 0 : i32
    return %arg0, %c0_i32, %c0_i32_0 : i32, i32, i32
  }
}

</mosaic_0001>

<bundles_post_ra>
// kernel: tpu_custom_call.1
= control target key start
LH: loop header
LB: loop body
LE: loop exit
PB: predicated region body
PF: predicated region fallthrough
CT: control target
= control target key end

     0   :  { %s3325_s0 = inlined_call_operand.hbm [shape: f32[2,8,32], index: 0, kind: input, shape index: {}]   ;;  %s3326_s1 = inlined_call_operand.hbm [shape: f32[8,32], index: 1, kind: input, shape index: {}]   ;;  %s3327_s2 = inlined_call_operand.hbm [shape: f32[2,1,8], index: 2, kind: input, shape index: {}]   ;;  %s3328_s3 = inlined_call_operand.hbm [shape: f32[2,1,32], index: 3, kind: input, shape index: {}]   ;;  %s3329_s4 = inlined_call_operand.vmem [shape: f32[2,1,32], index: 4, kind: input, shape index: {}]   ;;  %s3330_s5 = inlined_call_operand.vmem [shape: bf16[2,32,96], index: 5, kind: input, shape index: {}]   ;;  %s3331_s6 = inlined_call_operand.vmem [shape: f32[2,1,96], index: 6, kind: input, shape index: {}]   ;;  %s3332_s7 = inlined_call_operand.vmem [shape: bf16[2,32,32], index: 7, kind: input, shape index: {}]   ;;  %s3333_s8 = inlined_call_operand.vmem [shape: f32[2,1,32], index: 8, kind: input, shape index: {}]   ;;  %s3334_s9 = inlined_call_operand.hbm [shape: f32[2,1,32], index: 9, kind: input, shape index: {}]   ;;  %s3335_s10 = inlined_call_operand.vmem [shape: f32[2,1,32], index: 10, kind: input, shape index: {}]   ;;  %s3336_s11 = inlined_call_operand.vmem [shape: bf16[2,32,64], index: 11, kind: input, shape index: {}]   ;;  %s3337_s12 = inlined_call_operand.vmem [shape: f32[2,1,64], index: 12, kind: input, shape index: {}]   ;;  %s3338_s13 = inlined_call_operand.vmem [shape: bf16[2,64,32], index: 13, kind: input, shape index: {}]   ;;  %s3339_s14 = inlined_call_operand.vmem [shape: f32[2,1,32], index: 14, kind: input, shape index: {}]   ;;  %s3340_s15 = inlined_call_operand.vmem [shape: f32[1,32], index: 15, kind: input, shape index: {}]   ;;  %s3341_s16 = inlined_call_operand.vmem [shape: f32[1,32], index: 16, kind: input, shape index: {}]   ;;  %s3342_s17 = inlined_call_operand.hbm [shape: f32[2,8,32], index: 17, kind: output, shape index: {}]  }
   0x1   :  { %3348 = sst [smem:[#allocation24_spill]] %s3325_s0 }
   0x2   :  { %3349 = sst [smem:[#allocation25_spill]] %s3326_s1 }
   0x3   :  { %3350 = sst [smem:[#allocation26_spill]] %s3327_s2 }
   0x4   :  { %3351 = sst [smem:[#allocation27_spill]] %s3328_s3 }
   0x5   :  { %3352 = sst [smem:[#allocation28_spill]] %s3330_s5 }
   0x6   :  { %3353 = sst [smem:[#allocation29_spill]] %s3331_s6 }
   0x7   :  { %3354 = sst [smem:[#allocation30_spill]] %s3332_s7 }
   0x8   :  { %3355 = sst [smem:[#allocation31_spill]] %s3333_s8 }
   0x9   :  { %3356 = sst [smem:[#allocation32_spill]] %s3334_s9 }
   0xa   :  { %3357 = sst [smem:[#allocation33_spill]] %s3335_s10 }
   0xb   :  { %3358 = sst [smem:[#allocation34_spill]] %s3336_s11 }
   0xc   :  { %3359 = sst [smem:[#allocation35_spill]] %s3337_s12 }
   0xd   :  { %3360 = sst [smem:[#allocation36_spill]] %s3338_s13 }
   0xe   :  { %3361 = sst [smem:[#allocation37_spill]] %s3339_s14 }
   0xf   :  { %3362 = sst [smem:[#allocation38_spill]] %s3340_s15 }
  0x10   :  { %3363 = sst [smem:[#allocation39_spill]] %s3341_s16 }
  0x11   :  { %3364 = sst [smem:[#allocation40_spill]] %s3342_s17 }
  0x12   :  { %22 = vsyncpa [#allocation6], 0 }
  0x13   :  { %23 = vsyncpa [#allocation9], 0 }
  0x14   :  { %24 = vsyncpa [#allocation12], 0 }
  0x15   :  { %26 = vsyncpa [#allocation12 + $0x1], 0 }
  0x16   :  { %27 = vsyncpa [#allocation7], 0  ;;  %s2875_s24 = smov 0   ;;  %s2877_s25 = smov 0  }
  0x17   :  { %s2879_s26 = smov 0   ;;  %s2881_s27 = smov 0  }
  0x18   :  { %s2883_s28 = smov 0   ;;  %s2885_s29 = smov 0  }
  0x19 LB: > { %3365 = sst [smem:[#allocation19_spill]] %s2746_s26  ;;  %s2904_s0 = sadd.s32 4294967295, %s2758_s29   ;;  %s2758_s29 = sphi %s2885_s29, %s33_s29   ;;  %s2754_s28 = sphi %s2883_s28, %s3400_s28   ;;  %s2750_s27 = sphi %s2881_s27, %s3399_s27   ;;  %s2746_s26 = sphi %s2879_s26, %s3398_s26   ;;  %s2742_s25 = sphi %s2877_s25, %s3402_s25   ;;  %s2738_s24 = sphi %s2875_s24, %s3401_s24  }
  0x1a   : > { %3366 = sst [smem:[#allocation20_spill]] %s2754_s28  ;;  %p145_p0 = scmp.ne.s32.totalorder %s2742_s25, %s2738_s24 }
  0x1b   : > { %3367 = sst [smem:[#allocation21_spill]] %s2758_s29  ;;  %p146_p1 = scmp.eq.s32.totalorder %s2904_s0, 0 }
  0x1c   : > { %p2185_p2 = scmp.ge.s32.totalorder %s2758_s29, 1  ;;  %p516_p3 = scmp.lt.s32.totalorder %s2758_s29, 3 }
  0x1d   : > { %p2912_p4 = por %p146_p1, %p145_p0  ;;  %s3369_s1 = sld [smem:[#allocation25_spill]] }
  0x1e   : > { %p2919_p5 = pnand %p2185_p2, %p516_p3  ;;  %s2760_s22 = smov [#allocation8]  }
  0x1f   : > { %s547_s23 = sshll.u32 %s2760_s22, 4  ;;  %s48_s18 = sadd.s32 1, %s2754_s28  ;;  %s548_s23 = int_to_ptr.vmem [resolvable:$true] %s547_s23 }
  0x20   : > { %p2358_p6 = pneg %p2919_p5  ;;  %p50_p8 = scmp.ge.s32.totalorder %s48_s18, 2 }
  0x21   : > { %s132_s19 = sadd.s32 1, %s2746_s26  ;;  %p139_p9 = scmp.ne.s32.totalorder %s2746_s26, %s2742_s25 }
  0x22   : > { %p2927_p7 = pnand %p2358_p6, %p146_p1  ;;  %p140_p10 = scmp.eq.s32.totalorder %s2758_s29, 0 }
  0x23   : > { %s545_s20 = sshll.u32 %s3369_s1, 4  ;;  %s3404_s18 = smov (%p50_p8, %s48_s18), 0  ;;  %s546_s20 = int_to_ptr.hbm [resolvable:$true] %s545_s20 }
  0x24   : > { %2364 = dma.hbm_to_vmem [thread:$0]  (!%p2927_p7), %s546_s20, 128, %s548_s23, [#allocation9]  }
  0x25   : > { %3372 = sst [smem:[#allocation22_spill]] %s3404_s18  ;;  %p2940_p11 = por %p140_p10, %p139_p9 }
  0x26   : > { %p2378_p12 = scmp.lt.s32.totalorder %s2758_s29, 2  ;;  %s129_s22 = ssub.s32 %s2754_s28, %s3404_s18 }
  0x27   : > { %s580_s17 = sand.u32 1, %s2758_s29   ;;  %p130_p13 = scmp.eq.s32.totalorder %s129_s22, 0 }
  0x28   : > { %s3343_s16 = sand.u32 1, %s2746_s26   ;;  %s3374_s3 = sld [smem:[#allocation27_spill]] }
  0x29   : > { %s2954_s14 = scalar_select %p130_p13, %s2746_s26, %s132_s19  }
  0x2a   : > { %s583_s12 = scalar_lea.vmem [#allocation11], %s3343_s16  ;;  %p2960_p0 = pnand %p2378_p12, %p2940_p11 }
  0x2b   : > { %3375 = sst [smem:[#allocation23_spill]] %s2954_s14  ;;  %s590_s11 = sshll.u32 %s583_s12, 4  ;;  %s591_s11 = int_to_ptr.vmem [resolvable:$true] %s590_s11 }
  0x2c   : > { %s581_s22 = scalar_lea.sflag [#allocation12], %s580_s17  ;;  %s3377_s19 = sld [smem:[#allocation24_spill]] }
  0x2d   : > { %s2761_s16 = smov [#allocation5]   ;;  %s3378_s2 = sld [smem:[#allocation26_spill]] }
  0x2e   : > { %s586_s23 = scalar_lea.hbm %s3374_s3, %s2754_s28  ;;  %s532_s12 = sshll.u32 %s2761_s16, 4  ;;  %s533_s12 = int_to_ptr.vmem [resolvable:$true] %s532_s12 }
  0x2f   : > { %s588_s13 = sshll.u32 %s586_s23, 4  ;;  %s2762_s14 = smov 128   ;;  %s589_s13 = int_to_ptr.hbm [resolvable:$true] %s588_s13 }
  0x30   : > { %2371 = dma.hbm_to_vmem [thread:$0]  (!%p2960_p0), %s589_s13, 16, %s591_s11, %s581_s22  }
  0x31   : > { %s2763_s17 = smov 8   ;;  %s2764_s11 = smov [#allocation10]  }
  0x32   : > { %s530_s23 = sshll.u32 %s3377_s19, 4  ;;  %s560_s13 = sshll.u32 %s2764_s11, 4  ;;  %s531_s23 = int_to_ptr.hbm [resolvable:$true] %s530_s23  ;;  %s561_s13 = int_to_ptr.vmem [resolvable:$true] %s560_s13 }
  0x33   : > { %s558_s18 = sshll.u32 %s3378_s2, 4  ;;  %s2765_s15 = smov 16   ;;  %s559_s18 = int_to_ptr.hbm [resolvable:$true] %s558_s18 }
  0x34   : > { %2361 = dma.hbm_to_vmem [thread:$0]  (!%p2927_p7), %s531_s23, 256, %s533_s12, [#allocation6], %s2762_s14, %s2762_s14, %s2763_s17  }
  0x35   : > { %s2766_s20 = smov 1   ;;  %s3379_s9 = sld [smem:[#allocation32_spill]] }
  0x36   : > { %2367 = dma.hbm_to_vmem [thread:$0]  (!%p2927_p7), %s559_s18, 32, %s561_s13, [#allocation9], %s2765_s15, %s2765_s15, %s2766_s20  }
  0x37   : > { %s3380_s8 = sand.u32 1, %s2746_s26  }
  0x38   : > { %s634_s3 = scalar_lea.vmem [#allocation13], %s3380_s8 }
  0x39   : > { %s641_s1 = sshll.u32 %s634_s3, 4  ;;  %695 = sbr.rel (%p2919_p5) target bundleno = 2706 (0xa92), region = 88  ;;  %s642_s1 = int_to_ptr.vmem [resolvable:$true] %s641_s1 }
  0x3b   : > { %s637_s29 = scalar_lea.hbm %s3379_s9, %s2754_s28 }
  0x3c   : > { %s639_s2 = sshll.u32 %s637_s29, 4  ;;  %s640_s2 = int_to_ptr.hbm [resolvable:$true] %s639_s2 }
  0x3d   : > { %2374 = dma.hbm_to_vmem [thread:$0]  (!%p2960_p0), %s640_s2, 16, %s642_s1, %s581_s22  }
  0x3e   : > { %2721 = dma.done.wait (%p146_p1), [#allocation6], 256  }
  0x3f   : > { %2723 = vsyncadd (%p146_p1), [#allocation6], 4294967040 }
  0x40   : > { %2725 = dma.done.wait (%p146_p1), [#allocation9], 160  }
  0x41   : > { %2727 = vsyncadd (%p146_p1), [#allocation9], 4294967136  ;;  %s712_s8 = sand.u32 1, %s2904_s0   ;;  %s714_s2 = sand.u32 1, %s2742_s25  }
  0x42   : > { %s713_s10 = scalar_lea.sflag [#allocation12], %s712_s8  ;;  %s2996_s14 = scalar_lea.vmem [#allocation11], %s714_s2 }
  0x43   : > { %2729 = dma.done.wait (%p2912_p4), %s713_s10, 32  }
  0x44   : > { %2731 = vsyncadd (%p2912_p4), %s713_s10, 4294967264  ;;  %p824_p2 = scmp.lt.s32.totalorder %s2750_s27, 1  ;;  %p875_p3 = scmp.eq.s32.totalorder %s2750_s27, 0 }
  0x45   : > { %s3381_s5 = sld [smem:[#allocation28_spill]]  ;;  %v881_v0 = vld [vmem:[#allocation5] sm:$0xff] (%p875_p3)  ;;  %v885_v1 = vld [vmem:[#allocation8] sm:$0xff] (%p875_p3)  ;;  %v882_v2 = vld [vmem:[#allocation5 + $0x8] sm:$0xff] (%p875_p3)  ;;  %vm888_vm0 = vcmask (%p875_p3), 261120  }
  0x46   : > { %s3005_s29 = scalar_select %p824_p2, %s2750_s27, 1  ;;  %v883_v3 = vmul.f32 (%p875_p3), 5.656854, %v881_v0  ;;  %v884_v4 = vmul.f32 (%p875_p3), 5.656854, %v882_v2 }
  0x47   : > { %s3382_s6 = sld [smem:[#allocation29_spill]] }
  0x48   : > { %s2312_s18 = sshll.u32 %s3005_s29, 4  ;;  %s3383_s7 = sld [smem:[#allocation30_spill]]  ;;  %v886_v5 = vadd.f32 (%p875_p3), %v885_v1, %v883_v3  ;;  %v887_v6 = vadd.f32 (%p875_p3), %v885_v1, %v884_v4 }
  0x49   : > { %s3384_s1 = sld [smem:[#allocation31_spill]]  ;;  %s2315_s20 = sshll.u32 %s3005_s29, 5 }
  0x4a   : > { %s3385_s24 = sld [smem:[#allocation33_spill]]  ;;  %889 = vst.msk [vmem:[#allocation2] sm:$0xff] (%p875_p3), %vm888_vm0, %v886_v5 }
  0x4b   : > { %s3015_s12 = scalar_lea.vmem %s3381_s5, %s2312_s18  ;;  %s3386_s5 = sld [smem:[#allocation34_spill]]  ;;  %890 = vst.msk [vmem:[#allocation2 + $0x8] sm:$0xff] (%p875_p3), %vm888_vm0, %v887_v6 }
  0x4c   : > { %s3387_s9 = sld [smem:[#allocation35_spill]] }
  0x4d   : > { %s3021_s13 = scalar_lea.vmem %s3382_s6, %s3005_s29  ;;  %s3388_s16 = sld [smem:[#allocation36_spill]] }
  0x4e   : > { %s3026_s19 = scalar_lea.vmem %s3383_s7, %s2312_s18  ;;  %s3389_s10 = sld [smem:[#allocation37_spill]] }
  0x4f   : > { %s3032_s8 = scalar_lea.vmem %s3384_s1, %s3005_s29 }
  0x50   : > { %s845_s22 = scalar_lea.vmem %s3385_s24, %s3005_s29  ;;  %s3059_s24 = scalar_lea.vmem [#allocation13], %s714_s2 }
  0x51   : > { %s3041_s17 = scalar_lea.vmem %s3386_s5, %s2312_s18  ;;  %880 = sbr.rel (!%p875_p3) target bundleno = 86 (0x56), region = 112 }
  0x52   : > { %s3047_s15 = scalar_lea.vmem %s3387_s9, %s3005_s29 }
  0x53   : > { %s3053_s3 = scalar_lea.vmem %s3388_s16, %s2315_s20 }
  0x54   : > { %s872_s21 = scalar_lea.vmem %s3389_s10, %s3005_s29 }
  0x56 PF: > { %v3063_v7 = vld [vmem:[#allocation2] sm:$0xff]  ;;  %vm898_vm1 = vcmask 261120   ;;  %v2767_v9 = vmov 32.0   ;;  %v2318_v21 = vld [vmem:[%s3015_s12 + $0x8] sm:$0xff]  ;;  %s3390_s7 = scalar_lea.vmem %s3329_s4, %s3005_s29  ;;  %s2768_s9 = smov 112   ;;  %vm1006_vm6 = vcmask 64512  }
  0x57   : > { %v899_v8 = vsel %vm898_vm1, %v3063_v7, 0.0  ;;  %2470 = vrcp.f32 %v2767_v9  ;;  %991 = vmatpush.bf16.msra.mxu0 %v2318_v21  ;;  %v2317_v22 = vld [vmem:[%s3015_s12] sm:$0xff]  ;;  %s2769_s26 = smov 120   ;;  %s2770_s28 = smov 96   ;;  %v3107_v44 = vld [vmem:[#allocation2 + $0x8] sm:$0xff]  ;;  %vm1042_vm7 = vcmask 1043456  }
  0x58   : > { %900 = vadd.xlane.f32.xlu0 %v899_v8  ;;  %v3076_v32 = vld [vmem:[%s2996_s14] ss:$0 sm:$0xff]  ;;  %s2771_s2 = smov 64   ;;  %s2772_s14 = smov 80   ;;  %v902_v45 = vsel %vm898_vm1, %v3107_v44, 0.0  ;;  %vm1241_vm11 = vcmask 130048  }
  0x59   : > { %v3083_v35 = vld [vmem:[%s3390_s7] ss:$0 sm:$0xff]  ;;  %s2773_s30 = smov 88   ;;  %s2774_s18 = smov 104   ;;  %vm1243_vm12 = vcmask 195584   ;;  %vm1664_vm0 = vcmask 257024  }
  0x5a   : > { %v2459_v39 = vld [vmem:[%s3021_s13] ss:$0 sm:$0xff]  ;;  %s2775_s23 = smov 72   ;;  %s2776_s11 = smov 48  }
  0x5b   : > { %992 = vmatpush.bf16.msra.mxu0 %v2317_v22  ;;  %v2460_v0 = vld [vmem:[#allocation10] ss:$0 sm:$0xff]  ;;  %s2777_s20 = smov 56   ;;  %s2778_s16 = smov 40  }
  0x5c   : > { %s2780_s1 = smov 8   ;;  %p1870_p1 = scmp.eq.s32.totalorder %s2750_s27, 1 }
  0x5d   : > { %v2471_v10 = vpop.eup %2470  ;;  %s3394_s5 = sld [smem:[#allocation39_spill]] (%p1870_p1) }
  0x5e   : > { %v906_v11 = vmul.f32 32.0, %v2471_v10  ;;  %vm910_vm2 = vweird.f32 %v2471_v10 }
  0x60   : > { %v907_v12 = vsub.f32 1.0, %v906_v11 }
  0x62   : > { %v908_v13 = vmul.f32 %v2471_v10, %v907_v12 }
  0x64   : > { %v909_v14 = vadd.f32 %v2471_v10, %v908_v13 }
  0x66   : > { %v3067_v15 = vsel %vm910_vm2, %v2471_v10, %v909_v14  ;;  %vm1742_vm2 = vcmask 523264  }
  0xcb   : > { %v901_v16 = vpop.xlane.xlu0 %900 }
  0xcc   : > { %v912_v17 = vmul.f32 %v3067_v15, %v901_v16 }
  0xce   : > { %v914_v18 = vsub.f32 %v3063_v7, %v912_v17 }
  0xd0   : > { %v916_v19 = vmul.f32 %v914_v18, %v914_v18 }
  0xd2   : > { %v918_v20 = vsel %vm898_vm1, %v916_v19, 0.0 }
  0xd3   : > { %919 = vadd.xlane.f32.xlu0 %v918_v20 }
 0x146   : > { %v920_v23 = vpop.xlane.xlu0 %919 }
 0x147   : > { %v924_v24 = vmul.f32 %v920_v23, %v3067_v15 }
 0x149   : > { %v926_v25 = vadd.f32 1e-05, %v924_v24 }
 0x14b   : > { %2472 = vrsqrt.f32 %v926_v25  ;;  %vm934_vm4 = vweird.f32 %v926_v25 }
 0x151   : > { %v2473_v26 = vpop.eup %2472 }
 0x152   : > { %v929_v27 = vmul.f32 %v2473_v26, %v926_v25  ;;  %vm935_vm3 = vweird.f32 %v2473_v26 }
 0x153   : > { %vm936_vm5 = vmor %vm934_vm4, %vm935_vm3 }
 0x154   : > { %v930_v28 = vmul.f32 %v2473_v26, %v929_v27 }
 0x156   : > { %v931_v29 = vmul.f32 0.5, %v930_v28 }
 0x158   : > { %v932_v30 = vsub.f32 1.5, %v931_v29 }
 0x15a   : > { %v933_v31 = vmul.f32 %v2473_v26, %v932_v30 }
 0x15c   : > { %v937_v33 = vsel %vm936_vm5, %v2473_v26, %v933_v31 }
 0x15d   : > { %v948_v34 = vmul.f32 %v937_v33, %v914_v18 }
 0x15f   : > { %v953_v36 = vmul.f32 %v3076_v32, %v948_v34 }
 0x161   : > { %v958_v37 = vadd.f32 %v3083_v35, %v953_v36 }
 0x163   : > { %v960_v38 = vpack.c.bf16 %v958_v37, %v958_v37 }
 0x165   : > { %2211 = vmatmul.msk.bf16.vlgmr.msra.gmra.mxu0 %vm898_vm1, %v960_v38 }
 0x1e2   : > { %v994_v40 = vpop.f32.mrf.mxu0 }
 0x1e3   : > { %v995_v41 = vadd.f32 %v2459_v39, %v994_v40 }
 0x1e5   : > { %v3089_v42 = vpack.c.bf16 %v995_v41, %v995_v41 }
 0x1e7   : > { %1116 = vrot.lane.b32.xlu0 %v3089_v42, %s2768_s9  ;;  %1060 = vrot.lane.b32.xlu2 %v3089_v42, %s2769_s26 }
 0x1e8   : > { %1004 = vrot.lane.b32.xlu1 %v3089_v42, %s2770_s28 }
 0x1ea   : > { %v996_v43 = vpop.f32.mrf.mxu0 }
 0x1ef   : > { %1037 = vrot.lane.b32.xlu0 %v3089_v42, %s2771_s2  ;;  %1118 = vrot.lane.b32.xlu2 %v3089_v42, %s2772_s14 }
 0x1f0   : > { %1062 = vrot.lane.b32.xlu1 %v3089_v42, %s2773_s30 }
 0x1f7   : > { %1172 = vrot.lane.b32.xlu2 %v3089_v42, %s2774_s18 }
 0x1f8   : > { %1174 = vrot.lane.b32.xlu1 %v3089_v42, %s2775_s23 }
 0x222   : > { %903 = vadd.xlane.f32.xlu1 %v902_v45 }
 0x241   : > { %v1061_v46 = vpop.permute.xlu2 %1060 }
 0x249   : > { %v1119_v47 = vpop.permute.xlu2 %1118 }
 0x24a   : > { %v1124_v48 = vsel %vm1006_vm6, %v1119_v47, 0 }
 0x24b   : > { %1133 = vmatpush.bf16.xpose.msrb.mxu0 %v1124_v48 }
 0x251   : > { %v1173_v58 = vpop.permute.xlu2 %1172 }
 0x259   : > { %v1117_v49 = vpop.permute.xlu0 %1116 }
 0x25a   : > { %v1005_v50 = vpop.permute.xlu1 %1004  ;;  %2216 = vmatmul.msk.bf16.vlgmr.msrb.gmra.mxu0 %vm1006_vm6, %v1117_v49 }
 0x25b   : > { %v1011_v51 = vsel %vm1006_vm6, %v1005_v50, 0  ;;  %v2321_v50 = vld [vmem:[%s3015_s12] sm:$0xff] }
 0x25c   : > { %1020 = vmatpush.bf16.xpose.msra.mxu1 %v1011_v51 }
 0x261   : > { %v1038_v52 = vpop.permute.xlu0 %1037 }
 0x262   : > { %v1063_v53 = vpop.permute.xlu1 %1062  ;;  %v1044_v54 = vsel %vm1042_vm7, %v1038_v52, 0 }
 0x263   : > { %2212 = vmatmul.msk.bf16.vlgmr.msra.gmra.mxu1 %vm1006_vm6, %v3089_v42  ;;  %1053 = vmatpush.bf16.msra.mxu2 %v1044_v54  ;;  %v1068_v55 = vsel %vm1006_vm6, %v1063_v53, 0 }
 0x264   : > { %1077 = vmatpush.bf16.xpose.msra.mxu3 %v1068_v55 }
 0x26a   : > { %v1175_v56 = vpop.permute.xlu1 %1174 }
 0x26b   : > { %2214 = vmatmul.msk.bf16.vlgmr.msra.gmra.mxu3 %vm1006_vm6, %v1061_v46  ;;  %v1180_v57 = vsel %vm1006_vm6, %v1175_v56, 0 }
 0x26c   : > { %1189 = vmatpush.bf16.xpose.msrb.mxu3 %v1180_v57 }
 0x27b   : > { %2218 = vmatmul.msk.bf16.vlgmr.msrb.gmra.mxu3 %vm1006_vm6, %v1173_v58 }
 0x295   : > { %v904_v59 = vpop.xlane.xlu1 %903 }
 0x296   : > { %v913_v60 = vmul.f32 %v3067_v15, %v904_v59 }
 0x298   : > { %v3123_v61 = vsub.f32 %v3107_v44, %v913_v60 }
 0x29a   : > { %v917_v62 = vmul.f32 %v3123_v61, %v3123_v61 }
 0x29c   : > { %v921_v63 = vsel %vm898_vm1, %v917_v62, 0.0 }
 0x29d   : > { %922 = vadd.xlane.f32.xlu2 %v921_v63 }
 0x2d7   : > { %v1135_v1 = vpop.f32.mrf.mxu0 }
 0x2d8   : > { %v1136_v2 = vadd.f32 %v2460_v0, %v1135_v1 }
 0x2da   : > { %v1139_v3 = vsel %vm1006_vm6, %v1136_v2, -inf }
 0x2db   : > { %1140 = vmax.xlane.f32.xlu1 %v1139_v3 }
 0x2df   : > { %v1137_v4 = vpop.f32.mrf.mxu0 }
 0x2e0   : > { %v1022_v5 = vpop.f32.mrf.mxu1 }
 0x2e1   : > { %v1023_v6 = vadd.f32 %v2460_v0, %v1022_v5 }
 0x2e3   : > { %v1026_v8 = vsel %vm1006_vm6, %v1023_v6, -inf }
 0x2e4   : > { %1027 = vmax.xlane.f32.xlu2 %v1026_v8 }
 0x2e8   : > { %v1024_v9 = vpop.f32.mrf.mxu1 }
 0x2ee   : > { %v1079_v10 = vpop.f32.mrf.mxu3 }
 0x2ef   : > { %v1080_v11 = vadd.f32 %v2460_v0, %v1079_v10 }
 0x2f1   : > { %v1083_v12 = vsel %vm1006_vm6, %v1080_v11, -inf }
 0x2f2   : > { %1084 = vmax.xlane.f32.xlu0 %v1083_v12 }
 0x2f4   : > { %1150 = vrot.lane.b32.xlu1 %v3089_v42, %s2776_s11 }
 0x2f6   : > { %v1081_v13 = vpop.f32.mrf.mxu3 }
 0x2fc   : > { %1094 = vrot.lane.b32.xlu2 %v3089_v42, %s2777_s20 }
 0x2fe   : > { %v1191_v14 = vpop.f32.mrf.mxu3 }
 0x2ff   : > { %v1192_v16 = vadd.f32 %v2460_v0, %v1191_v14 }
 0x301   : > { %v1195_v17 = vsel %vm1006_vm6, %v1192_v16, -inf }
 0x302   : > { %1196 = vmax.xlane.f32.xlu0 %v1195_v17 }
 0x306   : > { %v1193_v18 = vpop.f32.mrf.mxu3 }
 0x310   : > { %v923_v19 = vpop.xlane.xlu2 %922 }
 0x311   : > { %v925_v20 = vmul.f32 %v923_v19, %v3067_v15 }
 0x313   : > { %v927_v21 = vadd.f32 1e-05, %v925_v20 }
 0x315   : > { %2474 = vrsqrt.f32 %v927_v21  ;;  %vm944_vm8 = vweird.f32 %v927_v21 }
 0x316   : > { %1206 = vrot.lane.b32.xlu0 %v3089_v42, %s2778_s16  ;;  %v2322_v42 = vld [vmem:[%s3015_s12 + $0x8] sm:$0xff]  ;;  %s2779_s12 = smov 16  }
 0x31b   : > { %v2475_v25 = vpop.eup %2474 }
 0x31c   : > { %v939_v26 = vmul.f32 %v2475_v25, %v927_v21  ;;  %vm945_vm9 = vweird.f32 %v2475_v25 }
 0x31d   : > { %vm946_vm10 = vmor %vm944_vm8, %vm945_vm9 }
 0x31e   : > { %v940_v30 = vmul.f32 %v2475_v25, %v939_v26  ;;  %v2320_v26 = vld [vmem:[%s3026_s19 + $0x8] sm:$0xff] }
 0x31f   : > { %1275 = vmatpush.bf16.msra.mxu0 %v2320_v26 }
 0x320   : > { %v941_v34 = vmul.f32 0.5, %v940_v30 }
 0x322   : > { %v942_v39 = vsub.f32 1.5, %v941_v34 }
 0x324   : > { %v943_v43 = vmul.f32 %v2475_v25, %v942_v39 }
 0x326   : > { %v947_v51 = vsel %vm946_vm10, %v2475_v25, %v943_v43 }
 0x327   : > { %v949_v52 = vmul.f32 %v947_v51, %v3123_v61 }
 0x329   : > { %v954_v54 = vmul.f32 %v3076_v32, %v949_v52 }
 0x32b   : > { %v959_v58 = vadd.f32 %v3083_v35, %v954_v54  ;;  %v2462_v54 = vld [vmem:[#allocation10 + $0x1] ss:$0 sm:$0xff] }
 0x32d   : > { %v961_v63 = vpack.c.bf16 %v959_v58, %v959_v58 }
 0x34e   : > { %v1141_v22 = vpop.xlane.xlu1 %1140 }
 0x34f   : > { %v1142_v23 = vsub.f32 %v1136_v2, %v1141_v22 }
 0x351   : > { %v1143_v24 = vmul.f32 1.442695, %v1142_v23 }
 0x353   : > { %2476 = vpow2.f32 %v1143_v24 }
 0x357   : > { %v1028_v27 = vpop.xlane.xlu2 %1027 }
 0x358   : > { %v1029_v28 = vsub.f32 %v1023_v6, %v1028_v27  ;;  %v2319_v27 = vld [vmem:[%s3026_s19] sm:$0xff] }
 0x359   : > { %v2477_v29 = vpop.eup %2476  ;;  %1276 = vmatpush.bf16.msra.mxu0 %v2319_v27 }
 0x35a   : > { %v1030_v31 = vmul.f32 1.442695, %v1029_v28  ;;  %v1145_v33 = vsel %vm1006_vm6, %v2477_v29, 0.0  ;;  %v1149_v49 = vpack.c.bf16 %v2477_v29, %v2477_v29 }
 0x35b   : > { %1146 = vadd.xlane.f32.xlu1 %v1145_v33 }
 0x35c   : > { %2478 = vpow2.f32 %v1030_v31 }
 0x35f   : > { %v1095_v36 = vpop.permute.xlu2 %1094 }
 0x360   : > { %v1100_v37 = vsel %vm1042_vm7, %v1095_v36, 0 }
 0x361   : > { %1109 = vmatpush.bf16.msrb.mxu2 %v1100_v37 }
 0x362   : > { %v2479_v38 = vpop.eup %2478 }
 0x363   : > { %v1036_v40 = vpack.c.bf16 %v2479_v38, %v2479_v38  ;;  %v1032_v62 = vsel %vm1006_vm6, %v2479_v38, 0.0 }
 0x365   : > { %v1085_v41 = vpop.xlane.xlu0 %1084  ;;  %2213 = vmatmul.msk.bf16.vlgmr.msra.gmra.mxu2 %vm1006_vm6, %v1036_v40 }
 0x366   : > { %v1086_v45 = vsub.f32 %v1080_v11, %v1085_v41  ;;  %v1151_v46 = vpop.permute.xlu1 %1150  ;;  %v2461_v11 = vld [vmem:[%s3021_s13] ss:$0 sm:$0xff]  ;;  %s2781_s13 = smov 24  }
 0x367   : > { %v1156_v47 = vsel %vm1042_vm7, %v1151_v46, 0 }
 0x368   : > { %v1087_v48 = vmul.f32 1.442695, %v1086_v45  ;;  %1165 = vmatpush.bf16.msrb.mxu1 %v1156_v47 }
 0x36a   : > { %2480 = vpow2.f32 %v1087_v48 }
 0x36b   : > { %2217 = vmatmul.msk.bf16.vlgmr.msrb.gmra.mxu1 %vm1006_vm6, %v1149_v49 }
 0x36c   : > { %1313 = vmatpush.bf16.msra.mxu1 %v2322_v42 }
 0x370   : > { %1314 = vmatpush.bf16.msra.mxu1 %v2321_v50  ;;  %v2481_v53 = vpop.eup %2480 }
 0x371   : > { %v1089_v55 = vsel %vm1006_vm6, %v2481_v53, 0.0  ;;  %v1093_v56 = vpack.c.bf16 %v2481_v53, %v2481_v53 }
 0x372   : > { %1090 = vadd.xlane.f32.xlu2 %v1089_v55 }
 0x375   : > { %v1197_v57 = vpop.xlane.xlu0 %1196  ;;  %2215 = vmatmul.msk.bf16.vlgmr.msrb.gmra.mxu2 %vm1006_vm6, %v1093_v56 }
 0x376   : > { %v1198_v59 = vsub.f32 %v1192_v16, %v1197_v57 }
 0x378   : > { %v1199_v60 = vmul.f32 1.442695, %v1198_v59  ;;  %v2463_v59 = vld [vmem:[%s3032_s8] ss:$0 sm:$0xff] }
 0x37a   : > { %2482 = vpow2.f32 %v1199_v60  ;;  %1033 = vadd.xlane.f32.xlu2 %v1032_v62 }
 0x37b   : > { %2237 = vmatmul.msk.bf16.vlgmr.msra.gmra.mxu1 %vm898_vm1, %v961_v63 }
 0x380   : > { %v2483_v61 = vpop.eup %2482 }
 0x381   : > { %v1201_v32 = vsel %vm1006_vm6, %v2483_v61, 0.0  ;;  %v1205_v2 = vpack.c.bf16 %v2483_v61, %v2483_v61 }
 0x382   : > { %1202 = vadd.xlane.f32.xlu0 %v1201_v32 }
 0x388   : > { %v1207_v0 = vpop.permute.xlu0 %1206 }
 0x389   : > { %v1212_v1 = vsel %vm1042_vm7, %v1207_v0, 0 }
 0x38a   : > { %1221 = vmatpush.bf16.msra.mxu2 %v1212_v1 }
 0x38d   : > { %2219 = vmatmul.msk.bf16.vlgmr.msra.gmra.mxu2 %vm1006_vm6, %v1205_v2 }
 0x3ce   : > { %v1147_v35 = vpop.xlane.xlu1 %1146 }
 0x3cf   : > { %2484 = vrcp.f32 %v1147_v35 }
 0x3d5   : > { %v2485_v3 = vpop.eup %2484 }
 0x3e5   : > { %v1091_v8 = vpop.xlane.xlu2 %1090 }
 0x3e6   : > { %2486 = vrcp.f32 %v1091_v8 }
 0x3e8   : > { %v1055_v4 = vpop.f32.mrf.mxu2  ;;  %v1167_v5 = vpop.f32.mrf.mxu1 }
 0x3e9   : > { %v1171_v6 = vmul.f32 %v2485_v3, %v1167_v5 }
 0x3eb   : > { %1233 = vrot.lane.b32.xlu0 %v1171_v6, %s2779_s12 }
 0x3ec   : > { %v2487_v12 = vpop.eup %2486 }
 0x3ed   : > { %v1034_v28 = vpop.xlane.xlu2 %1033 }
 0x3f0   : > { %v1057_v9 = vpop.f32.mrf.mxu2  ;;  %v1169_v10 = vpop.f32.mrf.mxu1 }
 0x3f5   : > { %v1203_v21 = vpop.xlane.xlu0 %1202 }
 0x3f6   : > { %2488 = vrcp.f32 %v1203_v21 }
 0x3f7   : > { %2490 = vrcp.f32 %v1034_v28 }
 0x3f8   : > { %v1111_v13 = vpop.f32.mrf.mxu2  ;;  %v1316_v14 = vpop.f32.mrf.mxu1 }
 0x3f9   : > { %v1115_v16 = vmul.f32 %v2487_v12, %v1111_v13  ;;  %v1317_v17 = vadd.f32 %v2461_v11, %v1316_v14 }
 0x3fb   : > { %v3158_v18 = vpack.c.bf16 %v1317_v17, %v1317_v17  ;;  %1229 = vrot.lane.b32.xlu1 %v1115_v16, %s2780_s1 }
 0x3fc   : > { %v2489_v22 = vpop.eup %2488 }
 0x3fd   : > { %1327 = vrot.lane.b32.xlu2 %v3158_v18, %s2770_s28  ;;  %1381 = vrot.lane.b32.xlu0 %v3158_v18, %s2769_s26  ;;  %v2491_v38 = vpop.eup %2490 }
 0x3fe   : > { %v1059_v41 = vmul.f32 %v2491_v38, %v1055_v4 }
 0x400   : > { %v1113_v19 = vpop.f32.mrf.mxu2  ;;  %v1318_v20 = vpop.f32.mrf.mxu1 }
 0x405   : > { %1383 = vrot.lane.b32.xlu2 %v3158_v18, %s2773_s30  ;;  %1493 = vrot.lane.b32.xlu0 %v3158_v18, %s2774_s18 }
 0x40d   : > { %1437 = vrot.lane.b32.xlu2 %v3158_v18, %s2768_s9  ;;  %1359 = vrot.lane.b32.xlu0 %v3158_v18, %s2771_s2 }
 0x410   : > { %v1223_v23 = vpop.f32.mrf.mxu2 }
 0x411   : > { %v1227_v24 = vmul.f32 %v2489_v22, %v1223_v23 }
 0x413   : > { %1237 = vrot.lane.b32.xlu1 %v1227_v24, %s2781_s13 }
 0x418   : > { %v1225_v25 = vpop.f32.mrf.mxu2 }
 0x41b   : > { %1439 = vrot.lane.b32.xlu1 %v3158_v18, %s2772_s14 }
 0x423   : > { %1495 = vrot.lane.b32.xlu1 %v3158_v18, %s2775_s23 }
 0x457   : > { %v1328_v29 = vpop.permute.xlu2 %1327 }
 0x458   : > { %v1333_v30 = vsel %vm1006_vm6, %v1328_v29, 0 }
 0x459   : > { %1342 = vmatpush.bf16.xpose.msra.mxu3 %v1333_v30 }
 0x45d   : > { %v1234_v34 = vpop.permute.xlu0 %1233 }
 0x45f   : > { %v1384_v31 = vpop.permute.xlu2 %1383 }
 0x460   : > { %v1389_v33 = vsel %vm1006_vm6, %v1384_v31, 0  ;;  %2238 = vmatmul.msk.bf16.vlgmr.msra.gmra.mxu3 %vm1006_vm6, %v3158_v18 }
 0x461   : > { %1398 = vmatpush.bf16.xpose.msrb.mxu0 %v1389_v33 }
 0x467   : > { %v1438_v51 = vpop.permute.xlu2 %1437 }
 0x46d   : > { %v1230_v39 = vpop.permute.xlu1 %1229 }
 0x46e   : > { %v1240_v43 = vsel %vm1006_vm6, %v1059_v41, %v1230_v39 }
 0x46f   : > { %v1382_v36 = vpop.permute.xlu0 %1381  ;;  %v1242_v45 = vsel %vm1241_vm11, %v1240_v43, %v1234_v34 }
 0x477   : > { %v1494_v37 = vpop.permute.xlu0 %1493 }
 0x47f   : > { %v1360_v40 = vpop.permute.xlu0 %1359 }
 0x480   : > { %v1365_v42 = vsel %vm1042_vm7, %v1360_v40, 0 }
 0x481   : > { %1374 = vmatpush.bf16.msrb.mxu2 %v1365_v42 }
 0x485   : > { %v1238_v46 = vpop.permute.xlu1 %1237 }
 0x486   : > { %v1244_v47 = vsel %vm1243_vm12, %v1242_v45, %v1238_v46 }
 0x487   : > { %v1245_v48 = vpack.c.bf16 %v1244_v47, %v1244_v47 }
 0x489   : > { %2228 = vmatmul.msk.bf16.vlgmr.msra.gmra.mxu0 %vm898_vm1, %v1245_v48 }
 0x48d   : > { %v1440_v49 = vpop.permute.xlu1 %1439 }
 0x48e   : > { %v1445_v50 = vsel %vm1006_vm6, %v1440_v49, 0 }
 0x48f   : > { %1454 = vmatpush.bf16.xpose.msrb.mxu3 %v1445_v50 }
 0x495   : > { %v1496_v52 = vpop.permute.xlu1 %1495 }
 0x496   : > { %v1501_v53 = vsel %vm1006_vm6, %v1496_v52, 0  ;;  %2242 = vmatmul.msk.bf16.vlgmr.msrb.gmra.mxu3 %vm1006_vm6, %v1438_v51 }
 0x497   : > { %1510 = vmatpush.bf16.xpose.msra.mxu0 %v1501_v53 }
 0x499   : > { %2240 = vmatmul.msk.bf16.vlgmr.msrb.gmra.mxu0 %vm1006_vm6, %v1382_v36 }
 0x4a9   : > { %2244 = vmatmul.msk.bf16.vlgmr.msra.gmra.mxu0 %vm1006_vm6, %v1494_v37 }
 0x4e3   : > { %v1344_v55 = vpop.f32.mrf.mxu3 }
 0x4e4   : > { %v1345_v56 = vadd.f32 %v2462_v54, %v1344_v55 }
 0x4e6   : > { %v1348_v57 = vsel %vm1006_vm6, %v1345_v56, -inf }
 0x4e7   : > { %1349 = vmax.xlane.f32.xlu2 %v1348_v57 }
 0x4eb   : > { %v1346_v58 = vpop.f32.mrf.mxu3 }
 0x4ff   : > { %1415 = vrot.lane.b32.xlu2 %v3158_v18, %s2777_s20 }
 0x506   : > { %v1278_v60 = vpop.f32.mrf.mxu0 }
 0x507   : > { %v1279_v62 = vadd.f32 %v2463_v59, %v1278_v60 }
 0x509   : > { %v1282_v63 = vadd.f32 %v1279_v62, %v3063_v7 }
 0x50b   : > { %1283 = vst.msk [vmem:[#allocation2] sm:$0xff] %vm898_vm1, %v1282_v63 }
 0x50e   : > { %v1280_v61 = vpop.f32.mrf.mxu0 }
 0x50f   : > { %v2324_v61 = vld [vmem:[%s3026_s19 + $0x8] sm:$0xff] }
 0x510   : > { %1594 = vmatpush.bf16.msra.mxu3 %v2324_v61 }
 0x512   : > { %v3221_v62 = vld [vmem:[#allocation2] sm:$0xff] }
 0x513   : > { %v1608_v63 = vsel %vm898_vm1, %v3221_v62, 0.0 }
 0x516   : > { %v1400_v32 = vpop.f32.mrf.mxu0 }
 0x517   : > { %v1401_v0 = vadd.f32 %v2462_v54, %v1400_v32  ;;  %v2323_v32 = vld [vmem:[%s3026_s19] sm:$0xff] }
 0x518   : > { %1595 = vmatpush.bf16.msra.mxu3 %v2323_v32  ;;  %v2782_v32 = vmov 0.0  }
 0x519   : > { %v1456_v1 = vpop.f32.mrf.mxu3  ;;  %v1404_v2 = vsel %vm1006_vm6, %v1401_v0, -inf  ;;  %1667 = vst.msk [vmem:[#allocation4] sm:$0xff] %vm898_vm1, %v2782_v32 }
 0x51a   : > { %v1457_v35 = vadd.f32 %v2462_v54, %v1456_v1  ;;  %1405 = vmax.xlane.f32.xlu1 %v1404_v2  ;;  %1668 = vst.msk [vmem:[#allocation4 + $0x8] sm:$0xff] %vm898_vm1, %v2782_v32 }
 0x51c   : > { %v1460_v3 = vsel %vm1006_vm6, %v1457_v35, -inf }
 0x51d   : > { %1461 = vmax.xlane.f32.xlu0 %v1460_v3 }
 0x51e   : > { %v1402_v4 = vpop.f32.mrf.mxu0 }
 0x521   : > { %v1458_v5 = vpop.f32.mrf.mxu3 }
 0x526   : > { %v1512_v6 = vpop.f32.mrf.mxu0 }
 0x527   : > { %v1513_v8 = vadd.f32 %v2462_v54, %v1512_v6 }
 0x529   : > { %v1516_v9 = vsel %vm1006_vm6, %v1513_v8, -inf }
 0x52a   : > { %1517 = vmax.xlane.f32.xlu1 %v1516_v9 }
 0x52e   : > { %v1514_v7 = vpop.f32.mrf.mxu0 }
 0x531   : > { %1527 = vrot.lane.b32.xlu0 %v3158_v18, %s2778_s16 }
 0x543   : > { %1471 = vrot.lane.b32.xlu1 %v3158_v18, %s2776_s11 }
 0x55a   : > { %v1350_v10 = vpop.xlane.xlu2 %1349 }
 0x55b   : > { %v1351_v11 = vsub.f32 %v1345_v56, %v1350_v10 }
 0x55d   : > { %v1352_v12 = vmul.f32 1.442695, %v1351_v11 }
 0x55f   : > { %2492 = vpow2.f32 %v1352_v12 }
 0x562   : > { %v1416_v13 = vpop.permute.xlu2 %1415 }
 0x563   : > { %v1421_v14 = vsel %vm1042_vm7, %v1416_v13, 0 }
 0x564   : > { %1430 = vmatpush.bf16.msrb.mxu1 %v1421_v14  ;;  %v2464_v14 = vld [vmem:[%s3032_s8] ss:$0 sm:$0xff] }
 0x565   : > { %v2493_v16 = vpop.eup %2492 }
 0x566   : > { %v1358_v17 = vpack.c.bf16 %v2493_v16, %v2493_v16  ;;  %v1354_v33 = vsel %vm1006_vm6, %v2493_v16, 0.0 }
 0x568   : > { %2239 = vmatmul.msk.bf16.vlgmr.msrb.gmra.mxu2 %vm1006_vm6, %v1358_v17 }
 0x58d   : > { %v1406_v19 = vpop.xlane.xlu1 %1405 }
 0x58e   : > { %v1407_v20 = vsub.f32 %v1401_v0, %v1406_v19 }
 0x590   : > { %v1408_v21 = vmul.f32 1.442695, %v1407_v20  ;;  %v1462_v22 = vpop.xlane.xlu0 %1461 }
 0x591   : > { %v1463_v23 = vsub.f32 %v1457_v35, %v1462_v22 }
 0x592   : > { %2494 = vpow2.f32 %v1408_v21 }
 0x593   : > { %v1464_v24 = vmul.f32 1.442695, %v1463_v23  ;;  %v2326_v23 = vld [vmem:[%s3041_s17 + $0x8] sm:$0xff] }
 0x595   : > { %2496 = vpow2.f32 %v1464_v24 }
 0x598   : > { %v2495_v18 = vpop.eup %2494 }
 0x599   : > { %v1414_v25 = vpack.c.bf16 %v2495_v18, %v2495_v18  ;;  %v1410_v26 = vsel %vm1006_vm6, %v2495_v18, 0.0  ;;  %v2325_v18 = vld [vmem:[%s3041_s17] sm:$0xff] }
 0x59a   : > { %1411 = vadd.xlane.f32.xlu2 %v1410_v26 }
 0x59b   : > { %v2497_v27 = vpop.eup %2496  ;;  %2241 = vmatmul.msk.bf16.vlgmr.msrb.gmra.mxu1 %vm1006_vm6, %v1414_v25 }
 0x59c   : > { %v1466_v28 = vsel %vm1006_vm6, %v2497_v27, 0.0  ;;  %v1470_v42 = vpack.c.bf16 %v2497_v27, %v2497_v27 }
 0x59d   : > { %1467 = vadd.xlane.f32.xlu0 %v1466_v28  ;;  %v1518_v29 = vpop.xlane.xlu1 %1517 }
 0x59e   : > { %v1519_v30 = vsub.f32 %v1513_v8, %v1518_v29 }
 0x5a0   : > { %v1520_v31 = vmul.f32 1.442695, %v1519_v30 }
 0x5a2   : > { %2498 = vpow2.f32 %v1520_v31  ;;  %1355 = vadd.xlane.f32.xlu2 %v1354_v33  ;;  %v2465_v33 = vld [vmem:[%s3059_s24] ss:$0 sm:$0xff] }
 0x5a3   : > { %v1528_v34 = vpop.permute.xlu0 %1527 }
 0x5a4   : > { %v1533_v36 = vsel %vm1042_vm7, %v1528_v34, 0 }
 0x5a5   : > { %1542 = vmatpush.bf16.msra.mxu1 %v1533_v36  ;;  %v2466_v36 = vld [vmem:[%s845_s22] ss:$0 sm:$0xff] }
 0x5a8   : > { %v2499_v37 = vpop.eup %2498 }
 0x5a9   : > { %v1526_v38 = vpack.c.bf16 %v2499_v37, %v2499_v37  ;;  %v1522_v39 = vsel %vm1006_vm6, %v2499_v37, 0.0 }
 0x5aa   : > { %1523 = vadd.xlane.f32.xlu1 %v1522_v39 }
 0x5ab   : > { %2245 = vmatmul.msk.bf16.vlgmr.msra.gmra.mxu1 %vm1006_vm6, %v1526_v38 }
 0x5b5   : > { %v1472_v40 = vpop.permute.xlu1 %1471 }
 0x5b6   : > { %v1477_v41 = vsel %vm1042_vm7, %v1472_v40, 0 }
 0x5b7   : > { %1486 = vmatpush.bf16.msra.mxu2 %v1477_v41 }
 0x5ba   : > { %2243 = vmatmul.msk.bf16.vlgmr.msra.gmra.mxu2 %vm1006_vm6, %v1470_v42  ;;  %v2330_v42 = vld [vmem:[%s3053_s3 + $0x18] sm:$0xff] }
 0x5bb   : > { %1700 = vmatpush.bf16.msrb.mxu2 %v2326_v23  ;;  %1750 = vmatpush.bf16.msrb.mxu0 %v2330_v42 }
 0x5bf   : > { %1701 = vmatpush.bf16.msrb.mxu2 %v2325_v18  ;;  %v2333_v18 = vld [vmem:[%s3053_s3] sm:$0xff] }
 0x5eb   : > { %v1376_v43 = vpop.f32.mrf.mxu2 }
 0x5f3   : > { %v1378_v45 = vpop.f32.mrf.mxu2 }
 0x60d   : > { %v1412_v46 = vpop.xlane.xlu2 %1411 }
 0x60e   : > { %2500 = vrcp.f32 %v1412_v46 }
 0x610   : > { %v1468_v56 = vpop.xlane.xlu0 %1467 }
 0x614   : > { %v2501_v47 = vpop.eup %2500 }
 0x615   : > { %v1356_v0 = vpop.xlane.xlu2 %1355 }
 0x618   : > { %v1432_v48 = vpop.f32.mrf.mxu1 }
 0x619   : > { %v1436_v49 = vmul.f32 %v2501_v47, %v1432_v48 }
 0x61b   : > { %1550 = vrot.lane.b32.xlu2 %v1436_v49, %s2780_s1 }
 0x61d   : > { %v1524_v50 = vpop.xlane.xlu1 %1523 }
 0x61e   : > { %2502 = vrcp.f32 %v1524_v50  ;;  %v2328_v50 = vld [vmem:[%s3053_s3 + $0x8] sm:$0xff] }
 0x61f   : > { %2504 = vrcp.f32 %v1468_v56 }
 0x620   : > { %v1434_v51 = vpop.f32.mrf.mxu1  ;;  %2506 = vrcp.f32 %v1356_v0 }
 0x621   : > { %v2327_v51 = vld [vmem:[%s3053_s3] sm:$0xff] }
 0x624   : > { %v2503_v52 = vpop.eup %2502 }
 0x625   : > { %v2505_v57 = vpop.eup %2504 }
 0x626   : > { %v2507_v1 = vpop.eup %2506 }
 0x627   : > { %v1380_v35 = vmul.f32 %v2507_v1, %v1376_v43  ;;  %v2329_v43 = vld [vmem:[%s3053_s3 + $0x10] sm:$0xff] }
 0x628   : > { %v1544_v53 = vpop.f32.mrf.mxu1  ;;  %1751 = vmatpush.bf16.msrb.mxu0 %v2329_v43 }
 0x629   : > { %v1548_v54 = vmul.f32 %v2503_v52, %v1544_v53  ;;  %v2467_v52 = vld [vmem:[%s3047_s15] ss:$0 sm:$0xff] }
 0x62b   : > { %1558 = vrot.lane.b32.xlu1 %v1548_v54, %s2781_s13 }
 0x62c   : > { %1752 = vmatpush.bf16.msrb.mxu0 %v2328_v50 }
 0x630   : > { %v1546_v55 = vpop.f32.mrf.mxu1  ;;  %1753 = vmatpush.bf16.msrb.mxu0 %v2327_v51 }
 0x63d   : > { %v1488_v58 = vpop.f32.mrf.mxu2 }
 0x63e   : > { %v1492_v59 = vmul.f32 %v2505_v57, %v1488_v58  ;;  %v2332_v58 = vld [vmem:[%s3041_s17 + $0x8] sm:$0xff] }
 0x63f   : > { %1792 = vmatpush.bf16.msrb.mxu1 %v2332_v58 }
 0x640   : > { %1554 = vrot.lane.b32.xlu0 %v1492_v59, %s2779_s12 }
 0x645   : > { %v1490_v60 = vpop.f32.mrf.mxu2 }
 0x646   : > { %v2331_v60 = vld [vmem:[%s3041_s17] sm:$0xff] }
 0x647   : > { %1793 = vmatpush.bf16.msrb.mxu1 %v2331_v60 }
 0x66a   : > { %1609 = vadd.xlane.f32.xlu0 %v1608_v63 }
 0x675   : > { %v1551_v2 = vpop.permute.xlu2 %1550 }
 0x676   : > { %v1561_v3 = vsel %vm1006_vm6, %v1380_v35, %v1551_v2 }
 0x69d   : > { %v1559_v5 = vpop.permute.xlu1 %1558 }
 0x6b2   : > { %v1555_v4 = vpop.permute.xlu0 %1554 }
 0x6b3   : > { %v1562_v6 = vsel %vm1241_vm11, %v1561_v3, %v1555_v4 }
 0x6b4   : > { %v1563_v8 = vsel %vm1243_vm12, %v1562_v6, %v1559_v5 }
 0x6b5   : > { %v1564_v9 = vpack.c.bf16 %v1563_v8, %v1563_v8 }
 0x6b7   : > { %2254 = vmatmul.msk.bf16.vlgmr.msra.gmra.mxu3 %vm898_vm1, %v1564_v9 }
 0x6dd   : > { %v1610_v7 = vpop.xlane.xlu0 %1609 }
 0x6de   : > { %v1614_v10 = vmul.f32 %v1610_v7, %v3067_v15 }
 0x6e0   : > { %v1616_v11 = vsub.f32 %v3221_v62, %v1614_v10 }
 0x6e2   : > { %v1618_v12 = vmul.f32 %v1616_v11, %v1616_v11 }
 0x6e4   : > { %v1620_v13 = vsel %vm898_vm1, %v1618_v12, 0.0  ;;  %v2335_v12 = vld [vmem:[%s3053_s3 + $0x10] sm:$0xff] }
 0x6e5   : > { %1621 = vadd.xlane.f32.xlu1 %v1620_v13  ;;  %v1708_v13 = vld [vmem:[#allocation4] sm:$0xff] }
 0x73a   : > { %v1597_v16 = vpop.f32.mrf.mxu3 }
 0x73b   : > { %v1598_v17 = vadd.f32 %v2464_v14, %v1597_v16 }
 0x73d   : > { %v1601_v19 = vadd.f32 %v1598_v17, %v3107_v44  ;;  %v2468_v17 = vld [vmem:[%s872_s21] ss:$0 sm:$0xff] }
 0x73f   : > { %1603 = vst.msk [vmem:[#allocation2 + $0x8] sm:$0xff] %vm898_vm1, %v1601_v19 }
 0x742   : > { %v1599_v20 = vpop.f32.mrf.mxu3 }
 0x746   : > { %v3237_v21 = vld [vmem:[#allocation2 + $0x8] sm:$0xff] }
 0x747   : > { %v1611_v22 = vsel %vm898_vm1, %v3237_v21, 0.0 }
 0x748   : > { %1612 = vadd.xlane.f32.xlu2 %v1611_v22 }
 0x758   : > { %v1622_v24 = vpop.xlane.xlu1 %1621 }
 0x759   : > { %v1626_v25 = vmul.f32 %v1622_v24, %v3067_v15  ;;  %v2334_v24 = vld [vmem:[%s3053_s3 + $0x8] sm:$0xff] }
 0x75b   : > { %v1628_v26 = vadd.f32 1e-05, %v1626_v25  ;;  %v2469_v25 = vld [vmem:[%s3047_s15] ss:$0 sm:$0xff]  ;;  %s3393_s15 = sld [smem:[#allocation38_spill]] (%p1870_p1) }
 0x75d   : > { %2508 = vrsqrt.f32 %v1628_v26  ;;  %vm1636_vm14 = vweird.f32 %v1628_v26 }
 0x763   : > { %v2509_v44 = vpop.eup %2508 }
 0x764   : > { %v1631_v27 = vmul.f32 %v2509_v44, %v1628_v26  ;;  %vm1637_vm13 = vweird.f32 %v2509_v44 }
 0x765   : > { %vm1638_vm15 = vmor %vm1636_vm14, %vm1637_vm13 }
 0x766   : > { %v1632_v28 = vmul.f32 %v2509_v44, %v1631_v27 }
 0x768   : > { %v1633_v29 = vmul.f32 0.5, %v1632_v28 }
 0x76a   : > { %v1634_v30 = vsub.f32 1.5, %v1633_v29 }
 0x76c   : > { %v1635_v31 = vmul.f32 %v2509_v44, %v1634_v30  ;;  %v1801_v30 = vld [vmem:[#allocation4 + $0x8] sm:$0xff] }
 0x76e   : > { %v1639_v34 = vsel %vm1638_vm15, %v2509_v44, %v1635_v31 }
 0x76f   : > { %v1650_v37 = vmul.f32 %v1639_v34, %v1616_v11  ;;  %v2336_v11 = vld [vmem:[%s3053_s3 + $0x18] sm:$0xff] }
 0x770   : > { %1842 = vmatpush.bf16.msrb.mxu3 %v2336_v11 }
 0x771   : > { %v1655_v38 = vmul.f32 %v2465_v33, %v1650_v37 }
 0x773   : > { %v1660_v39 = vadd.f32 %v2466_v36, %v1655_v38 }
 0x774   : > { %1843 = vmatpush.bf16.msrb.mxu3 %v2335_v12 }
 0x775   : > { %v1662_v40 = vpack.c.bf16 %v1660_v39, %v1660_v39 }
 0x777   : > { %1665 = vst.msk [vmem:[#allocation3] sm:$0xf] %vm1664_vm0, %v1662_v40 }
 0x778   : > { %1844 = vmatpush.bf16.msrb.mxu3 %v2334_v24 }
 0x77c   : > { %1845 = vmatpush.bf16.msrb.mxu3 %v2333_v18 }
 0x77e   : > { %v1669_v41 = vld [vmem:[#allocation3] sm:$0xf] }
 0x77f   : > { %2263 = vmatmul.msk.bf16.vlgmr.msrb.gmra.mxu2 %vm898_vm1, %v1669_v41 }
 0x7bb   : > { %v1613_v45 = vpop.xlane.xlu2 %1612 }
 0x7bc   : > { %v1615_v46 = vmul.f32 %v1613_v45, %v3067_v15 }
 0x7be   : > { %v1617_v47 = vsub.f32 %v3237_v21, %v1615_v46 }
 0x7c0   : > { %v1619_v48 = vmul.f32 %v1617_v47, %v1617_v47 }
 0x7c2   : > { %v1623_v49 = vsel %vm898_vm1, %v1619_v48, 0.0 }
 0x7c3   : > { %1624 = vadd.xlane.f32.xlu2 %v1623_v49 }
 0x802   : > { %v1703_v53 = vpop.f32.mrf.mxu2 }
 0x803   : > { %v1704_v54 = vadd.f32 %v2467_v52, %v1703_v53 }
 0x805   : > { %v1707_v55 = vmax.f32 %v1704_v54, 0.0 }
 0x807   : > { %v1709_v56 = vpack.c.bf16 %v1707_v55, %v1707_v55 }
 0x809   : > { %2280 = vmatmul.msk.bf16.vlgmr.msrb.gmra.mxu0 %vm1742_vm2, %v1709_v56 }
 0x80a   : > { %v1705_v57 = vpop.f32.mrf.mxu2 }
 0x836   : > { %v1625_v59 = vpop.xlane.xlu2 %1624 }
 0x837   : > { %v1627_v63 = vmul.f32 %v1625_v59, %v3067_v15 }
 0x839   : > { %v1629_v61 = vadd.f32 1e-05, %v1627_v63 }
 0x83b   : > { %2510 = vrsqrt.f32 %v1629_v61  ;;  %vm1646_vm4 = vweird.f32 %v1629_v61 }
 0x841   : > { %v2511_v0 = vpop.eup %2510 }
 0x842   : > { %v1641_v1 = vmul.f32 %v2511_v0, %v1629_v61  ;;  %vm1647_vm3 = vweird.f32 %v2511_v0 }
 0x843   : > { %vm1648_vm5 = vmor %vm1646_vm4, %vm1647_vm3 }
 0x844   : > { %v1642_v2 = vmul.f32 %v2511_v0, %v1641_v1 }
 0x846   : > { %v1643_v35 = vmul.f32 0.5, %v1642_v2  ;;  %v2512_v2 = vld [vmem:[%s3393_s15] ss:$0 sm:$0xff] (%p1870_p1) }
 0x848   : > { %v1644_v3 = vsub.f32 1.5, %v1643_v35 }
 0x84a   : > { %v1645_v4 = vmul.f32 %v2511_v0, %v1644_v3 }
 0x84c   : > { %v1649_v5 = vsel %vm1648_vm5, %v2511_v0, %v1645_v4 }
 0x84d   : > { %v1651_v6 = vmul.f32 %v1649_v5, %v1617_v47 }
 0x84f   : > { %v1656_v8 = vmul.f32 %v2465_v33, %v1651_v6 }
 0x851   : > { %v1661_v9 = vadd.f32 %v2466_v36, %v1656_v8 }
 0x853   : > { %v1663_v7 = vpack.c.bf16 %v1661_v9, %v1661_v9 }
 0x855   : > { %1666 = vst.msk [vmem:[#allocation3 + $0x4] sm:$0xf] %vm1664_vm0, %v1663_v7 }
 0x85c   : > { %v1762_v10 = vld [vmem:[#allocation3 + $0x4] sm:$0xf] }
 0x85d   : > { %2289 = vmatmul.msk.bf16.vlgmr.msrb.gmra.mxu1 %vm898_vm1, %v1762_v10 }
 0x886   : > { %v1755_v14 = vpop.f32.mrf.mxu0 }
 0x887   : > { %v1759_v16 = vadd.f32 %v1755_v14, %v1708_v13 }
 0x889   : > { %1760 = vst.msk [vmem:[#allocation4] sm:$0xff] %vm898_vm1, %v1759_v16 }
 0x88e   : > { %v1757_v19 = vpop.f32.mrf.mxu0 }
 0x890   : > { %v1856_v20 = vld [vmem:[#allocation4] sm:$0xff] }
 0x891   : > { %v1862_v22 = vadd.f32 %v2468_v17, %v1856_v20 }
 0x893   : > { %v1866_v23 = vadd.f32 %v3221_v62, %v1862_v22 }
 0x895   : > { %1868 = vst.msk [vmem:[#allocation2] sm:$0xff] %vm898_vm1, %v1866_v23 }
 0x89c   : > { %v1875_v38 = vld [vmem:[#allocation2] sm:$0xff] (%p1870_p1) }
 0x89d   : > { %v1879_v39 = vsel (%p1870_p1), %vm898_vm1, %v1875_v38, 0.0 }
 0x89e   : > { %1880 = vadd.xlane.f32.xlu0 (%p1870_p1), %v1879_v39 }
 0x8da   : > { %v1795_v26 = vpop.f32.mrf.mxu1 }
 0x8db   : > { %v1796_v44 = vadd.f32 %v2469_v25, %v1795_v26 }
 0x8dd   : > { %v1799_v27 = vmax.f32 %v1796_v44, 0.0 }
 0x8df   : > { %v1802_v28 = vpack.c.bf16 %v1799_v27, %v1799_v27 }
 0x8e1   : > { %2306 = vmatmul.msk.bf16.vlgmr.msrb.gmra.mxu3 %vm1742_vm2, %v1802_v28 }
 0x8e2   : > { %v1797_v29 = vpop.f32.mrf.mxu1 }
 0x911   : > { %v1881_v42 = vpop.xlane.xlu0 (%p1870_p1), %1880 }
 0x912   : > { %v1892_v43 = vmul.f32 (%p1870_p1), %v1881_v42, %v3067_v15 }
 0x914   : > { %v1894_v45 = vsub.f32 (%p1870_p1), %v1875_v38, %v1892_v43 }
 0x916   : > { %v1896_v46 = vmul.f32 (%p1870_p1), %v1894_v45, %v1894_v45 }
 0x918   : > { %v1898_v47 = vsel (%p1870_p1), %vm898_vm1, %v1896_v46, 0.0 }
 0x919   : > { %1899 = vadd.xlane.f32.xlu1 (%p1870_p1), %v1898_v47 }
 0x964   : > { %v1847_v31 = vpop.f32.mrf.mxu3 }
 0x965   : > { %v1851_v33 = vadd.f32 %v1847_v31, %v1801_v30 }
 0x967   : > { %1852 = vst.msk [vmem:[#allocation4 + $0x8] sm:$0xff] %vm898_vm1, %v1851_v33 }
 0x96c   : > { %v1849_v62 = vpop.f32.mrf.mxu3 }
 0x96e   : > { %v1857_v34 = vld [vmem:[#allocation4 + $0x8] sm:$0xff] }
 0x96f   : > { %v1863_v36 = vadd.f32 %v2468_v17, %v1857_v34  ;;  %1874 = sbr.rel (!%p1870_p1) target bundleno = 2696 (0xa88), region = 124 }
 0x971   : > { %v1867_v37 = vadd.f32 %v3237_v21, %v1863_v36 }
 0x973   : > { %1869 = vst.msk [vmem:[#allocation2 + $0x8] sm:$0xff] %vm898_vm1, %v1867_v37 }
 0x97a   : > { %v1876_v40 = vld [vmem:[#allocation2 + $0x8] sm:$0xff] }
 0x97b   : > { %v1882_v41 = vsel %vm898_vm1, %v1876_v40, 0.0 }
 0x97c   : > { %1883 = vadd.xlane.f32.xlu0 %v1882_v41 }
 0x98c   : > { %v1900_v52 = vpop.xlane.xlu1 %1899 }
 0x98d   : > { %v1904_v53 = vmul.f32 %v1900_v52, %v3067_v15 }
 0x98f   : > { %v1906_v54 = vadd.f32 1e-05, %v1904_v53 }
 0x991   : > { %2514 = vrsqrt.f32 %v1906_v54  ;;  %vm1914_vm7 = vweird.f32 %v1906_v54 }
 0x997   : > { %v2515_v57 = vpop.eup %2514 }
 0x998   : > { %v1909_v59 = vmul.f32 %v2515_v57, %v1906_v54  ;;  %vm1915_vm6 = vweird.f32 %v2515_v57 }
 0x999   : > { %vm1916_vm8 = vmor %vm1914_vm7, %vm1915_vm6 }
 0x99a   : > { %v1910_v60 = vmul.f32 %v2515_v57, %v1909_v59 }
 0x99c   : > { %v1911_v63 = vmul.f32 0.5, %v1910_v60 }
 0x99e   : > { %v1912_v61 = vsub.f32 1.5, %v1911_v63 }
 0x9a0   : > { %v1913_v0 = vmul.f32 %v2515_v57, %v1912_v61 }
 0x9a2   : > { %v1917_v35 = vsel %vm1916_vm8, %v2515_v57, %v1913_v0 }
 0x9a3   : > { %v1928_v4 = vmul.f32 %v1917_v35, %v1894_v45 }
 0x9a5   : > { %v1933_v6 = vmul.f32 %v2512_v2, %v1928_v4 }
 0x9ef   : > { %v1884_v21 = vpop.xlane.xlu0 %1883 }
 0x9f0   : > { %v1893_v48 = vmul.f32 %v1884_v21, %v3067_v15 }
 0x9f2   : > { %v1895_v49 = vsub.f32 %v1876_v40, %v1893_v48 }
 0x9f4   : > { %v1897_v50 = vmul.f32 %v1895_v49, %v1895_v49 }
 0x9f6   : > { %v1901_v51 = vsel %vm898_vm1, %v1897_v50, 0.0 }
 0x9f7   : > { %1902 = vadd.xlane.f32.xlu1 %v1901_v51 }
 0xa6a   : > { %v1903_v55 = vpop.xlane.xlu1 %1902 }
 0xa6b   : > { %v1905_v56 = vmul.f32 %v1903_v55, %v3067_v15  ;;  %v2513_v15 = vld [vmem:[%s3394_s5] ss:$0 sm:$0xff] }
 0xa6c   : > { %v1938_v9 = vadd.f32 %v2513_v15, %v1933_v6 }
 0xa6d   : > { %v1907_v58 = vadd.f32 1e-05, %v1905_v56 }
 0xa6e   : > { %1940 = vst.msk [vmem:[#allocation14] sm:$0xff] %vm898_vm1, %v1938_v9 }
 0xa6f   : > { %2516 = vrsqrt.f32 %v1907_v58  ;;  %vm1924_vm10 = vweird.f32 %v1907_v58 }
 0xa75   : > { %v2517_v32 = vpop.eup %2516 }
 0xa76   : > { %v1919_v1 = vmul.f32 %v2517_v32, %v1907_v58  ;;  %vm1925_vm9 = vweird.f32 %v2517_v32 }
 0xa77   : > { %vm1926_vm11 = vmor %vm1924_vm10, %vm1925_vm9 }
 0xa78   : > { %v1920_v3 = vmul.f32 %v2517_v32, %v1919_v1 }
 0xa7a   : > { %v1921_v5 = vmul.f32 0.5, %v1920_v3 }
 0xa7c   : > { %v1922_v8 = vsub.f32 1.5, %v1921_v5 }
 0xa7e   : > { %v1923_v7 = vmul.f32 %v2517_v32, %v1922_v8 }
 0xa80   : > { %v1927_v10 = vsel %vm1926_vm11, %v2517_v32, %v1923_v7 }
 0xa81   : > { %v1929_v11 = vmul.f32 %v1927_v10, %v1895_v49 }
 0xa83   : > { %v1934_v12 = vmul.f32 %v2512_v2, %v1929_v11 }
 0xa85   : > { %v1939_v13 = vadd.f32 %v2513_v15, %v1934_v12 }
 0xa87   : > { %1941 = vst.msk [vmem:[#allocation14 + $0x8] sm:$0xff] %vm898_vm1, %v1939_v13 }
 0xa88 PF: > { %p2382_p4 = scmp.eq.s32.totalorder %s2904_s0, 1  ;;  %s3395_s9 = sld [smem:[#allocation40_spill]] }
 0xa89   : > { %s2783_s28 = smov [#allocation14]   ;;  %s2784_s14 = smov 128  }
 0xa8a   : > { %s1950_s2 = sshll.u32 %s2783_s28, 4  ;;  %s1951_s2 = int_to_ptr.vmem [resolvable:$true] %s1950_s2 }
 0xa8e   : > { %s1952_s26 = sshll.u32 %s3395_s9, 4  ;;  %s1953_s26 = int_to_ptr.hbm [resolvable:$true] %s1952_s26 }
 0xa8f   : > { %2355 = dma.vmem_to_hbm [thread:$0]  (%p2382_p4), %s1951_s2, 256, %s1953_s26, [#allocation7], %s2784_s14, %s2784_s14, %s2780_s1  }
 0xa90   : > { %2733 = dma.done.wait (%p2382_p4), [#allocation7], 256  }
 0xa91   : > { %2735 = vsyncadd (%p2382_p4), [#allocation7], 4294967040 }
 0xa92 PF: > { %s3396_s30 = sld [smem:[#allocation21_spill]]  ;;  %s3401_s24 = smov %s2742_s25 }
 0xa93   : > { %s3397_s18 = sld [smem:[#allocation19_spill]] }
 0xa94   : > { %s3398_s26 = sld [smem:[#allocation23_spill]] }
 0xa95   : > { %s3399_s27 = sld [smem:[#allocation20_spill]] }
 0xa96   : > { %s3400_s28 = sld [smem:[#allocation22_spill]] }
 0xa98   : > { %s33_s29 = sadd.s32 1, %s3396_s30  }
 0xa99   : > { %p30_p5 = scmp.ge.s32.totalorder %s33_s29, 4   ;;  %s3402_s25 = smov %s3397_s18 }
 0xa9b   :  { %32 = sbr.rel (!%p30_p5) target bundleno = 25 (0x19), region = 202 }
 0xaa0   :  { %1969 = vsyncpa [#allocation6], 1 }
 0xaa1   :  { %1971 = vsyncpa [#allocation6 + $0x1], 1 }
 0xaa2   :  { %1972 = vsyncpa [#allocation9], 1 }
 0xaa3   :  { %1973 = vsyncpa [#allocation12], 1 }
 0xaa4   :  { %1975 = vsyncpa [#allocation12 + $0x1], 1 }
 0xaa5   :  { %1976 = vsyncpa [#allocation7], 1 }
 0xaa6   :  { %1978 = vsyncpa [#allocation7 + $0x1], 1 }

</bundles_post_ra>
